<compile_context>
chip_gen: v6e
topology: v6e:2x2x1
jax: 0.10.0
libtpu: 0.0.40
codegen_flags: <defaults>
</compile_context>

<pallas_src>
import functools

import jax
import jax.numpy as jnp
from jax.experimental import pallas as pl
from jax.experimental.pallas import tpu as pltpu

_EPS = 1e-5


def _ru(x, m):
    return (x + m - 1) // m * m


def _pad_to(x, rows, cols):
    r, c = x.shape
    if (r, c) == (rows, cols):
        return x
    return jnp.pad(x, ((0, rows - r), (0, cols - c)))


# ----------------------------------------------------------------------------
# Pallas kernel 1: tiled bf16 matmul with the BatchNorm column statistics fused
# into the last-K epilogue (per-output-channel sum and sum-of-squares).
#   grid = (j over N tiles [parallel], i over M tiles, k over K tiles)
#   outputs: y (Mp, Np) f32, col_sum (1, Np) f32, col_sumsq (1, Np) f32
# The stats outputs stay resident in VMEM across the i/k axes (accumulators);
# the weight (B) tile stays resident across all M tiles whenever K fits one
# block (all 1x1 convs), removing repeated weight DMA.
# ----------------------------------------------------------------------------
def _mm_bn_kernel(a_ref, b_ref, y_ref, s_ref, q_ref, acc_ref):
    i = pl.program_id(1)
    k = pl.program_id(2)

    @pl.when(k == 0)
    def _():
        acc_ref[...] = jnp.zeros_like(acc_ref)

    @pl.when(jnp.logical_and(i == 0, k == 0))
    def _():
        s_ref[...] = jnp.zeros_like(s_ref)
        q_ref[...] = jnp.zeros_like(q_ref)

    acc_ref[...] += jnp.dot(a_ref[...], b_ref[...],
                            preferred_element_type=jnp.float32)

    @pl.when(k == pl.num_programs(2) - 1)
    def _():
        y = acc_ref[...]
        y_ref[...] = y
        s_ref[...] += jnp.sum(y, axis=0, keepdims=True)
        q_ref[...] += jnp.sum(y * y, axis=0, keepdims=True)


@functools.lru_cache(maxsize=None)
def _get_fused_matmul(Mp, Kp, Np, tm, tn, tk):
    grid = (Np // tn, Mp // tm, Kp // tk)
    return pl.pallas_call(
        _mm_bn_kernel,
        out_shape=(jax.ShapeDtypeStruct((Mp, Np), jnp.float32),
                   jax.ShapeDtypeStruct((1, Np), jnp.float32),
                   jax.ShapeDtypeStruct((1, Np), jnp.float32)),
        grid_spec=pltpu.PrefetchScalarGridSpec(
            num_scalar_prefetch=0,
            grid=grid,
            in_specs=[pl.BlockSpec((tm, tk), lambda j, i, k: (i, k)),
                      pl.BlockSpec((tk, tn), lambda j, i, k: (k, j))],
            out_specs=(pl.BlockSpec((tm, tn), lambda j, i, k: (i, j)),
                       pl.BlockSpec((1, tn), lambda j, i, k: (0, j)),
                       pl.BlockSpec((1, tn), lambda j, i, k: (0, j))),
            scratch_shapes=[pltpu.VMEM((tm, tn), jnp.float32)]),
        compiler_params=pltpu.CompilerParams(
            dimension_semantics=("parallel", "arbitrary", "arbitrary")),
    )


def _mm_dims(M, K, N):
    Kp, Np = _ru(K, 128), _ru(N, 128)
    # Whole-K block (weights resident in VMEM across all M tiles) when small enough,
    # otherwise 512/256-wide K tiles.
    if Kp <= 2048:
        tk = Kp
    elif Kp % 512 == 0:
        tk = 512
    elif Kp % 256 == 0:
        tk = 256
    else:
        tk = 128
    tn = 256 if Np % 256 == 0 else 128
    if M > 256:
        tm, Mp = 256, _ru(M, 256)
    else:
        Mp = _ru(M, 16)
        tm = Mp
    return Mp, Kp, Np, tm, tn, tk


def fused_matmul(a, b_pad, n_true):
    """a: (M, K) bf16 (unpadded). b_pad: (ru(K,128), ru(N,128)) bf16, pre-padded weight matrix.

    Returns (y_pad, col_sum, col_sumsq): y_pad is the *padded* (Mp, Np) f32 product; the stats are
    unpadded (n_true,) vectors (padding rows/cols are zero and contribute nothing)."""
    M, K = a.shape
    Mp, Kp, Np, tm, tn, tk = _mm_dims(M, K, n_true)
    assert b_pad.shape == (Kp, Np), (b_pad.shape, (Kp, Np))
    if (M, K) != (Mp, Kp):
        a = jnp.pad(a, ((0, Mp - M), (0, Kp - K)))
    y, s, q = _get_fused_matmul(Mp, Kp, Np, tm, tn, tk)(a, b_pad)
    return y, s[0, :n_true], q[0, :n_true]


def _plain_matmul(a, b):
    """Small helper matmul (bilinear-interpolation matrices); the fused stats are discarded."""
    M, K = a.shape
    _, N = b.shape
    b_pad = _pad_to(b.astype(jnp.bfloat16), _ru(K, 128), _ru(N, 128))
    y, _, _ = fused_matmul(a.astype(jnp.bfloat16), b_pad, N)
    return y[:M, :N]


# ----------------------------------------------------------------------------
# Pallas kernel 2: fused  relu(x*scale + bias [+ residual])  elementwise
# ----------------------------------------------------------------------------
def _sb_relu_kernel(y_ref, s_ref, b_ref, o_ref):
    o_ref[...] = jnp.maximum(y_ref[...] * s_ref[...] + b_ref[...], 0.0)


def _sb_linear_kernel(y_ref, s_ref, b_ref, o_ref):
    o_ref[...] = y_ref[...] * s_ref[...] + b_ref[...]


def _sb_add_relu_kernel(y_ref, s_ref, b_ref, r_ref, o_ref):
    o_ref[...] = jnp.maximum(
        y_ref[...] * s_ref[...] + b_ref[...] + r_ref[...], 0.0)


@functools.lru_cache(maxsize=None)
def _get_sb_fn(Mp, Cp, tm, mode):
    y_spec = pl.BlockSpec((tm, Cp), lambda i: (i, 0))
    v_spec = pl.BlockSpec((1, Cp), lambda i: (0, 0))
    if mode == "add_relu":
        kern = _sb_add_relu_kernel
        in_specs = [y_spec, v_spec, v_spec,
                    pl.BlockSpec((tm, Cp), lambda i: (i, 0))]
    else:
        kern = _sb_relu_kernel if mode == "relu" else _sb_linear_kernel
        in_specs = [y_spec, v_spec, v_spec]
    return pl.pallas_call(
        kern,
        out_shape=jax.ShapeDtypeStruct((Mp, Cp), jnp.float32),
        grid_spec=pltpu.PrefetchScalarGridSpec(
            num_scalar_prefetch=0,
            grid=(Mp // tm,),
            in_specs=in_specs,
            out_specs=pl.BlockSpec((tm, Cp), lambda i: (i, 0))),
        compiler_params=pltpu.CompilerParams(
            dimension_semantics=("parallel",)),
    )


def _ew_row_tile(Mp, Cp, budget=2 << 20):
    for tm in (1024, 512, 256, 128):
        if Mp % tm == 0 and tm * Cp * 4 <= budget:
            return tm
    if Mp % 128 == 0:
        return 128
    return Mp        # small Mp (< 256, multiple of 16)


def _scale_bias(y_pad, scale_row, bias_row, residual=None, mode="relu"):
    Mp, Cp = y_pad.shape
    tm = _ew_row_tile(Mp, Cp)
    if residual is not None:
        return _get_sb_fn(Mp, Cp, tm, "add_relu")(y_pad, scale_row, bias_row, residual)
    return _get_sb_fn(Mp, Cp, tm, mode)(y_pad, scale_row, bias_row)


# ----------------------------------------------------------------------------
# conv + BN building blocks (jit-fused per shape signature)
# ----------------------------------------------------------------------------
def im2col(x, kh, kw, stride, padding, dilation):
    # TODO(synk): 3x3 taps are still materialized in HBM (im2col, now in bf16); in-kernel tap
    #             streaming via an extra grid axis would remove that traffic but is not done here.
    n, h, w, c = x.shape
    ho = (h + 2 * padding - dilation * (kh - 1) - 1) // stride + 1
    wo = (w + 2 * padding - dilation * (kw - 1) - 1) // stride + 1
    x = x.astype(jnp.bfloat16)
    if kh == 1 and kw == 1 and padding == 0:
        if stride != 1:
            x = x[:, ::stride, ::stride, :]
        return x.reshape(n * ho * wo, c), (n, ho, wo)
    xp = jnp.pad(x, ((0, 0), (padding, padding), (padding, padding), (0, 0)))
    cols = []
    for ki in range(kh):
        for kj in range(kw):
            hs, ws = ki * dilation, kj * dilation
            cols.append(xp[:, hs: hs + (ho - 1) * stride + 1: stride,
                           ws: ws + (wo - 1) * stride + 1: stride, :])
    a = jnp.concatenate(cols, axis=-1)
    return a.reshape(n * ho * wo, kh * kw * c), (n, ho, wo)


def _vec_row(v, cols):
    v = v[None, :].astype(jnp.float32)
    if v.shape[1] != cols:
        v = jnp.pad(v, ((0, 0), (0, cols - v.shape[1])))
    return v


@functools.partial(jax.jit,
                   static_argnames=("kh", "kw", "stride", "padding", "dilation", "relu"))
def conv_bn(x, wmat, gamma, beta, residual=None, *, kh, kw,
            stride=1, padding=0, dilation=1, relu=True):
    """conv -> BatchNorm (batch statistics) -> [+residual] -> [ReLU].

    A conv bias followed by training-mode BatchNorm cancels exactly (the batch mean absorbs it),
    so the decoder's biased 1x1 convs also use this bias-free path."""
    cout = gamma.shape[0]
    a, (n, ho, wo) = im2col(x, kh, kw, stride, padding, dilation)
    m = a.shape[0]
    y, s, q = fused_matmul(a, wmat, cout)             # y is padded (Mp, Np)
    cnt = float(m)
    mean = s / cnt
    # TODO(synk): single-pass E[x^2]-E[x]^2 variance; clamped at 0 to guard against cancellation.
    var = jnp.maximum(q / cnt - mean * mean, 0.0)
    inv = jax.lax.rsqrt(var + _EPS)
    scale = gamma * inv
    bias = beta - mean * scale
    mp, np_ = y.shape
    scale_r = _vec_row(scale, np_)
    bias_r = _vec_row(bias, np_)
    if residual is not None:
        r = _pad_to(residual.reshape(m, cout).astype(jnp.float32), mp, np_)
        out = _scale_bias(y, scale_r, bias_r, residual=r)
    else:
        out = _scale_bias(y, scale_r, bias_r, mode="relu" if relu else "linear")
    return out[:m, :cout].reshape(n, ho, wo, cout)


@functools.partial(jax.jit, static_argnames=("kh", "kw", "stride", "padding", "dilation"))
def conv_bias(x, wmat, bias, *, kh, kw, stride=1, padding=0, dilation=1):
    """Plain conv with bias (no BN / ReLU) - used by the final classifier conv."""
    cout = bias.shape[0]
    a, (n, ho, wo) = im2col(x, kh, kw, stride, padding, dilation)
    m = a.shape[0]
    y, _, _ = fused_matmul(a, wmat, cout)
    return (y[:m, :cout] + bias[None, :]).reshape(n, ho, wo, cout)


@jax.jit
def maxpool_3x3_s2_p1(x):
    # TODO(synk): maxpool kept in plain JAX (reduce_window); not on the matmul hot path.
    return jax.lax.reduce_window(
        x, -jnp.inf, jax.lax.max,
        window_dimensions=(1, 3, 3, 1),
        window_strides=(1, 2, 2, 1),
        padding=((0, 0), (1, 1), (1, 1), (0, 0)))


def _interp_matrix(out_size, in_size):
    # F.interpolate(mode='bilinear', align_corners=False) sampling weights as a dense matrix.
    i = jnp.arange(out_size, dtype=jnp.float32)
    src = jnp.clip((i + 0.5) * (in_size / out_size) - 0.5, 0.0, in_size - 1.0)
    lo = jnp.floor(src).astype(jnp.int32)
    hi = jnp.minimum(lo + 1, in_size - 1)
    frac = src - lo.astype(jnp.float32)
    return (jax.nn.one_hot(lo, in_size, dtype=jnp.float32) * (1.0 - frac)[:, None]
            + jax.nn.one_hot(hi, in_size, dtype=jnp.float32) * frac[:, None])


@functools.partial(jax.jit, static_argnums=(1, 2))
def bilinear_resize(x, out_h, out_w):
    # Bilinear interpolation as two dense interpolation matmuls (MXU via the Pallas matmul)
    # instead of gathers; 1x1 -> HxW (ASPP global-pool branch) is a pure broadcast.
    n, h, w, c = x.shape
    if h == 1 and w == 1:
        return jnp.broadcast_to(x, (n, out_h, out_w, c))
    if h == out_h and w == out_w:
        return x
    if h != out_h:
        rh = _interp_matrix(out_h, h)
        xh = jnp.transpose(x, (1, 0, 2, 3)).reshape(h, n * w * c)
        x = _plain_matmul(rh, xh).reshape(out_h, n, w, c).transpose(1, 0, 2, 3)
    if w != out_w:
        rw = _interp_matrix(out_w, w)
        xw = jnp.transpose(x, (2, 0, 1, 3)).reshape(w, n * out_h * c)
        x = _plain_matmul(rw, xw).reshape(out_w, n, out_h, c).transpose(1, 2, 0, 3)
    return x


# ----------------------------------------------------------------------------
# Deterministic parameter construction (shapes from the PyTorch __init__).
# Conv weights are reshaped to (kh*kw*cin, cout), cast to bf16 and padded to lane/tile multiples
# once here, so no per-forward weight reshuffling / padding is needed.
# ----------------------------------------------------------------------------
_PARAM_KEY = [jax.random.PRNGKey(1)]


def _next_key():
    k, sub = jax.random.split(_PARAM_KEY[0])
    _PARAM_KEY[0] = k
    return sub


def conv_w_mat(kh, kw, cin, cout):
    fan_in = kh * kw * cin
    w = jax.random.normal(_next_key(), (kh, kw, cin, cout),
                          jnp.float32) * (2.0 / fan_in) ** 0.5
    m = w.reshape(fan_in, cout).astype(jnp.bfloat16)
    return _pad_to(m, _ru(fan_in, 128), _ru(cout, 128))


def bn_params(c):
    gamma = 1.0 + 0.05 * jax.random.normal(_next_key(), (c,), jnp.float32)
    beta = 0.05 * jax.random.normal(_next_key(), (c,), jnp.float32)
    return (gamma, beta)


def conv_b(c):
    return 0.01 * jax.random.normal(_next_key(), (c,), jnp.float32)


def make_layer(inplanes, planes, blocks, stride):
    layers = []
    p = {"conv1": conv_w_mat(1, 1, inplanes, planes), "bn1": bn_params(planes),
         "conv2": conv_w_mat(3, 3, planes, planes), "bn2": bn_params(planes),
         "conv3": conv_w_mat(1, 1, planes, planes * 4), "bn3": bn_params(planes * 4)}
    if stride != 1 or inplanes != planes * 4:
        p["ds_conv"] = conv_w_mat(1, 1, inplanes, planes * 4)
        p["ds_bn"] = bn_params(planes * 4)
    layers.append(p)
    for _ in range(1, blocks):
        layers.append({
            "conv1": conv_w_mat(1, 1, planes * 4, planes), "bn1": bn_params(planes),
            "conv2": conv_w_mat(3, 3, planes, planes), "bn2": bn_params(planes),
            "conv3": conv_w_mat(1, 1, planes, planes * 4), "bn3": bn_params(planes * 4)})
    return layers


def make_assp_params(cin, cout=256):
    return {
        "w0": conv_w_mat(1, 1, cin, cout), "bn0": bn_params(cout),
        "w1": conv_w_mat(3, 3, cin, cout), "bn1": bn_params(cout),
        "w2": conv_w_mat(3, 3, cin, cout), "bn2": bn_params(cout),
        "w3": conv_w_mat(3, 3, cin, cout), "bn3": bn_params(cout),
        "w4": conv_w_mat(3, 3, cin, cout), "bn4": bn_params(cout),
        "w5": conv_w_mat(1, 1, cin, cout), "bn5": bn_params(cout),
        "wf": conv_w_mat(1, 1, cout * 6, cout), "bnf": bn_params(cout),
    }


def make_deeplab_params(nc):
    resnet = {
        "conv1": conv_w_mat(7, 7, 3, 64), "bn1": bn_params(64),
        "layer1": make_layer(64, 64, 3, 1),      # -> 256 ch
        "layer2": make_layer(256, 128, 4, 2),    # -> 512 ch
        "layer3": make_layer(512, 256, 23, 2),   # -> 1024 ch
    }
    # The decoder 1x1 convs (conv1/conv2/conv3) have biases in PyTorch, but each feeds directly
    # into the training-mode BatchNorm which subtracts the batch mean, so those biases cancel
    # exactly and are omitted. The final classifier conv keeps its bias (no BN after it).
    return {
        "resnet": resnet,
        "assp": make_assp_params(1024, 256),
        "conv1_w": conv_w_mat(1, 1, 1280, 256),
        "conv2_w": conv_w_mat(1, 1, 768, 256),
        "conv3_w": conv_w_mat(1, 1, 512, 256),
        "conv_w": conv_w_mat(1, 1, 256, nc), "conv_b": conv_b(nc),
        "bn": bn_params(256),   # shared BatchNorm2d(256), reused three times
    }


# ----------------------------------------------------------------------------
# Forward passes
# ----------------------------------------------------------------------------
def bottleneck_forward(x, p, stride):
    out = conv_bn(x, p["conv1"], *p["bn1"], kh=1, kw=1)
    out = conv_bn(out, p["conv2"], *p["bn2"], kh=3, kw=3, stride=stride, padding=1)
    if "ds_conv" in p:
        identity = conv_bn(x, p["ds_conv"], *p["ds_bn"], kh=1, kw=1,
                           stride=stride, relu=False)
    else:
        identity = x
    return conv_bn(out, p["conv3"], *p["bn3"], kh=1, kw=1, residual=identity)


def run_layer(x, blocks, first_stride):
    for idx, p in enumerate(blocks):
        x = bottleneck_forward(x, p, first_stride if idx == 0 else 1)
    return x


def assp_forward(x, p):
    x0 = conv_bn(x, p["w0"], *p["bn0"], kh=1, kw=1)
    x1 = conv_bn(x, p["w1"], *p["bn1"], kh=3, kw=3, padding=2, dilation=2)
    x2 = conv_bn(x, p["w2"], *p["bn2"], kh=3, kw=3, padding=3, dilation=3)
    x3 = conv_bn(x, p["w3"], *p["bn3"], kh=3, kw=3, padding=4, dilation=4)
    x4 = conv_bn(x, p["w4"], *p["bn4"], kh=3, kw=3, padding=5, dilation=5)
    x5 = jnp.mean(x, axis=(1, 2), keepdims=True)        # AdaptiveAvgPool2d(1)
    x5 = conv_bn(x5, p["w5"], *p["bn5"], kh=1, kw=1)
    x5 = bilinear_resize(x5, x4.shape[1], x4.shape[2])   # 1x1 -> HxW broadcast
    xc = jnp.concatenate([x0, x1, x2, x3, x4, x5], axis=-1)
    return conv_bn(xc, p["wf"], *p["bnf"], kh=1, kw=1)


def deeplabv3_forward(x_nchw, params):
    # layout: NCHW in / NCHW out (PyTorch), NHWC internally.
    x = jnp.transpose(x_nchw, (0, 2, 3, 1)).astype(jnp.float32)
    h, w = x.shape[1], x.shape[2]
    r = params["resnet"]

    x = conv_bn(x, r["conv1"], *r["bn1"], kh=7, kw=7, stride=2, padding=3)   # conv1 + bn1 + relu
    x = maxpool_3x3_s2_p1(x)

    x = run_layer(x, r["layer1"], 1); layer1 = x
    x = run_layer(x, r["layer2"], 2); layer2 = x
    x = run_layer(x, r["layer3"], 2); layer3 = x

    x = assp_forward(x, params["assp"])

    bn_g, bn_b = params["bn"]
    x = jnp.concatenate([x, layer3], axis=-1)
    x = conv_bn(x, params["conv1_w"], bn_g, bn_b, kh=1, kw=1)
    x = bilinear_resize(x, layer2.shape[1], layer2.shape[2])

    x = jnp.concatenate([x, layer2], axis=-1)
    x = conv_bn(x, params["conv2_w"], bn_g, bn_b, kh=1, kw=1)
    x = bilinear_resize(x, layer1.shape[1], layer1.shape[2])

    x = jnp.concatenate([x, layer1], axis=-1)
    x = conv_bn(x, params["conv3_w"], bn_g, bn_b, kh=1, kw=1)

    x = conv_bias(x, params["conv_w"], params["conv_b"], kh=1, kw=1)
    x = bilinear_resize(x, h, w)
    return jnp.transpose(x, (0, 3, 1, 2))


# ----------------------------------------------------------------------------
if __name__ == "__main__":
    nc = 5
    x = jax.random.normal(jax.random.PRNGKey(0), (2, 3, 32, 32), jnp.float32)
    params = make_deeplab_params(nc)

    out = deeplabv3_forward(x, params)
    out = jax.block_until_ready(out)

    assert out.shape == (2, nc, 32, 32), out.shape
    assert bool(jnp.isfinite(out).all())
    print("KERNEL_OK")
</pallas_src>

<mosaic_0001>
module attributes {stable_mosaic.version = 11 : i64} {
  func.func @_mm_bn_kernel(%arg0: i32, %arg1: i32, %arg2: i32, %arg3: memref<256x256xbf16, #tpu.memory_space<vmem>>, %arg4: memref<256x128xbf16, #tpu.memory_space<vmem>>, %arg5: memref<256x128xf32, #tpu.memory_space<vmem>>, %arg6: memref<1x128xf32, #tpu.memory_space<vmem>>, %arg7: memref<1x128xf32, #tpu.memory_space<vmem>>, %arg8: memref<256x128xf32, #tpu.memory_space<vmem>>) attributes {dimension_semantics = [#tpu.dimension_semantics<parallel>, #tpu.dimension_semantics<arbitrary>, #tpu.dimension_semantics<arbitrary>], iteration_bounds = array<i64: 1, 2, 1>, scalar_prefetch = 0 : i64, scratch_operands = 1 : i64, tpu.core_type = #tpu.core_type<tc>, window_params = [{transform_indices = @transform_0, window_bounds = array<i64: 256, 256>}, {transform_indices = @transform_1, window_bounds = array<i64: 256, 128>}, {transform_indices = @transform_2, window_bounds = array<i64: 256, 128>}, {transform_indices = @transform_3, window_bounds = array<i64: 1, 128>}, {transform_indices = @transform_4, window_bounds = array<i64: 1, 128>}]} {
    %c0_i32 = arith.constant 0 : i32
    %0 = arith.cmpi eq, %arg2, %c0_i32 : i32
    %1 = arith.extui %0 : i1 to i32
    %c0_i32_0 = arith.constant 0 : i32
    %2 = arith.cmpi ne, %1, %c0_i32_0 : i32
    scf.if %2 {
      %cst_13 = arith.constant 0.000000e+00 : f32
      %17 = vector.broadcast %cst_13 : f32 to vector<256x128xf32>
      %c0_14 = arith.constant 0 : index
      %c0_15 = arith.constant 0 : index
      %18 = vector.load %arg8[%c0_14, %c0_15] : memref<256x128xf32, #tpu.memory_space<vmem>>, vector<256x128xf32>
      tpu.vector_store %arg8[%c0_14, %c0_15], %17 {strides = array<i32>} : memref<256x128xf32, #tpu.memory_space<vmem>>, vector<256x128xf32>,
    } else {
    }
    %c0_i32_1 = arith.constant 0 : i32
    %3 = arith.cmpi eq, %arg1, %c0_i32_1 : i32
    %c0_i32_2 = arith.constant 0 : i32
    %4 = arith.cmpi eq, %arg2, %c0_i32_2 : i32
    %5 = arith.andi %3, %4 : i1
    %6 = arith.extui %5 : i1 to i32
    %c0_i32_3 = arith.constant 0 : i32
    %7 = arith.cmpi ne, %6, %c0_i32_3 : i32
    scf.if %7 {
      %cst_13 = arith.constant 0.000000e+00 : f32
      %17 = vector.broadcast %cst_13 : f32 to vector<1x128xf32>
      %c0_14 = arith.constant 0 : index
      %c0_15 = arith.constant 0 : index
      %18 = vector.load %arg6[%c0_14, %c0_15] : memref<1x128xf32, #tpu.memory_space<vmem>>, vector<1x128xf32>
      tpu.vector_store %arg6[%c0_14, %c0_15], %17 {strides = array<i32>} : memref<1x128xf32, #tpu.memory_space<vmem>>, vector<1x128xf32>,
      %cst_16 = arith.constant 0.000000e+00 : f32
      %19 = vector.broadcast %cst_16 : f32 to vector<1x128xf32>
      %c0_17 = arith.constant 0 : index
      %c0_18 = arith.constant 0 : index
      %20 = vector.load %arg7[%c0_17, %c0_18] : memref<1x128xf32, #tpu.memory_space<vmem>>, vector<1x128xf32>
      tpu.vector_store %arg7[%c0_17, %c0_18], %19 {strides = array<i32>} : memref<1x128xf32, #tpu.memory_space<vmem>>, vector<1x128xf32>,
    } else {
    }
    %c0 = arith.constant 0 : index
    %c0_4 = arith.constant 0 : index
    %8 = vector.load %arg8[%c0, %c0_4] : memref<256x128xf32, #tpu.memory_space<vmem>>, vector<256x128xf32>
    %c0_5 = arith.constant 0 : index
    %c0_6 = arith.constant 0 : index
    %9 = vector.load %arg3[%c0_5, %c0_6] : memref<256x256xbf16, #tpu.memory_space<vmem>>, vector<256x256xbf16>
    %c0_7 = arith.constant 0 : index
    %c0_8 = arith.constant 0 : index
    %10 = vector.load %arg4[%c0_7, %c0_8] : memref<256x128xbf16, #tpu.memory_space<vmem>>, vector<256x128xbf16>
    %cst = arith.constant dense<0.000000e+00> : vector<256x128xf32>
    %11 = tpu.matmul %9, %10, %cst {dimension_numbers = #tpu.dot_dimension_numbers<[1], [0], [0], [1], [0, 0, 1, 1], [], []>} : vector<256x256xbf16>, vector<256x128xbf16>, vector<256x128xf32> -> vector<256x128xf32>
    %12 = arith.addf %8, %11 : vector<256x128xf32>
    %c0_9 = arith.constant 0 : index
    %c0_10 = arith.constant 0 : index
    %13 = vector.load %arg8[%c0_9, %c0_10] : memref<256x128xf32, #tpu.memory_space<vmem>>, vector<256x128xf32>
    tpu.vector_store %arg8[%c0_9, %c0_10], %12 {strides = array<i32>} : memref<256x128xf32, #tpu.memory_space<vmem>>, vector<256x128xf32>,
    %c0_i32_11 = arith.constant 0 : i32
    %14 = arith.cmpi eq, %arg2, %c0_i32_11 : i32
    %15 = arith.extui %14 : i1 to i32
    %c0_i32_12 = arith.constant 0 : i32
    %16 = arith.cmpi ne, %15, %c0_i32_12 : i32
    scf.if %16 {
      %c0_13 = arith.constant 0 : index
      %c0_14 = arith.constant 0 : index
      %17 = vector.load %arg8[%c0_13, %c0_14] : memref<256x128xf32, #tpu.memory_space<vmem>>, vector<256x128xf32>
      %c0_15 = arith.constant 0 : index
      %c0_16 = arith.constant 0 : index
      %18 = vector.load %arg5[%c0_15, %c0_16] : memref<256x128xf32, #tpu.memory_space<vmem>>, vector<256x128xf32>
      tpu.vector_store %arg5[%c0_15, %c0_16], %17 {strides = array<i32>} : memref<256x128xf32, #tpu.memory_space<vmem>>, vector<256x128xf32>,
      %c0_17 = arith.constant 0 : index
      %c0_18 = arith.constant 0 : index
      %19 = vector.load %arg6[%c0_17, %c0_18] : memref<1x128xf32, #tpu.memory_space<vmem>>, vector<1x128xf32>
      %cst_19 = arith.constant dense<0.000000e+00> : vector<128xf32>
      %20 = vector.multi_reduction <add>, %17, %cst_19 [0] : vector<256x128xf32> to vector<128xf32>
      %21 = vector.shape_cast %20 : vector<128xf32> to vector<1x128xf32>
      %22 = arith.addf %19, %21 : vector<1x128xf32>
      %c0_20 = arith.constant 0 : index
      %c0_21 = arith.constant 0 : index
      %23 = vector.load %arg6[%c0_20, %c0_21] : memref<1x128xf32, #tpu.memory_space<vmem>>, vector<1x128xf32>
      tpu.vector_store %arg6[%c0_20, %c0_21], %22 {strides = array<i32>} : memref<1x128xf32, #tpu.memory_space<vmem>>, vector<1x128xf32>,
      %c0_22 = arith.constant 0 : index
      %c0_23 = arith.constant 0 : index
      %24 = vector.load %arg7[%c0_22, %c0_23] : memref<1x128xf32, #tpu.memory_space<vmem>>, vector<1x128xf32>
      %25 = arith.mulf %17, %17 : vector<256x128xf32>
      %cst_24 = arith.constant dense<0.000000e+00> : vector<128xf32>
      %26 = vector.multi_reduction <add>, %25, %cst_24 [0] : vector<256x128xf32> to vector<128xf32>
      %27 = vector.shape_cast %26 : vector<128xf32> to vector<1x128xf32>
      %28 = arith.addf %24, %27 : vector<1x128xf32>
      %c0_25 = arith.constant 0 : index
      %c0_26 = arith.constant 0 : index
      %29 = vector.load %arg7[%c0_25, %c0_26] : memref<1x128xf32, #tpu.memory_space<vmem>>, vector<1x128xf32>
      tpu.vector_store %arg7[%c0_25, %c0_26], %28 {strides = array<i32>} : memref<1x128xf32, #tpu.memory_space<vmem>>, vector<1x128xf32>,
    } else {
    }
    return
  }
  func.func @transform_0(%arg0: i32, %arg1: i32, %arg2: i32) -> (i32, i32) {
    %c0_i32 = arith.constant 0 : i32
    return %arg1, %arg2 : i32, i32
  }
  func.func @transform_1(%arg0: i32, %arg1: i32, %arg2: i32) -> (i32, i32) {
    %c0_i32 = arith.constant 0 : i32
    return %arg2, %arg0 : i32, i32
  }
  func.func @transform_2(%arg0: i32, %arg1: i32, %arg2: i32) -> (i32, i32) {
    %c0_i32 = arith.constant 0 : i32
    return %arg1, %arg0 : i32, i32
  }
  func.func @transform_3(%arg0: i32, %arg1: i32, %arg2: i32) -> (i32, i32) {
    %c0_i32 = arith.constant 0 : i32
    %c0_i32_0 = arith.constant 0 : i32
    return %c0_i32, %arg0 : i32, i32
  }
  func.func @transform_4(%arg0: i32, %arg1: i32, %arg2: i32) -> (i32, i32) {
    %c0_i32 = arith.constant 0 : i32
    %c0_i32_0 = arith.constant 0 : i32
    return %c0_i32, %arg0 : i32, i32
  }
}

module attributes {stable_mosaic.version = 11 : i64} {
  func.func @_sb_relu_kernel(%arg0: i32, %arg1: memref<512x128xf32, #tpu.memory_space<vmem>>, %arg2: memref<1x128xf32, #tpu.memory_space<vmem>>, %arg3: memref<1x128xf32, #tpu.memory_space<vmem>>, %arg4: memref<512x128xf32, #tpu.memory_space<vmem>>) attributes {dimension_semantics = [#tpu.dimension_semantics<parallel>], iteration_bounds = array<i64: 1>, scalar_prefetch = 0 : i64, scratch_operands = 0 : i64, tpu.core_type = #tpu.core_type<tc>, window_params = [{transform_indices = @transform_0, window_bounds = array<i64: 512, 128>}, {pipeline_mode = #tpu.pipeline_mode<synchronous>, transform_indices = @transform_1, window_bounds = array<i64: 1, 128>}, {pipeline_mode = #tpu.pipeline_mode<synchronous>, transform_indices = @transform_2, window_bounds = array<i64: 1, 128>}, {transform_indices = @transform_3, window_bounds = array<i64: 512, 128>}]} {
    %c0 = arith.constant 0 : index
    %c0_0 = arith.constant 0 : index
    %0 = vector.load %arg1[%c0, %c0_0] : memref<512x128xf32, #tpu.memory_space<vmem>>, vector<512x128xf32>
    %c0_1 = arith.constant 0 : index
    %c0_2 = arith.constant 0 : index
    %1 = vector.load %arg2[%c0_1, %c0_2] : memref<1x128xf32, #tpu.memory_space<vmem>>, vector<1x128xf32>
    %2 = vector.broadcast %1 : vector<1x128xf32> to vector<512x128xf32>
    %3 = arith.mulf %0, %2 : vector<512x128xf32>
    %c0_3 = arith.constant 0 : index
    %c0_4 = arith.constant 0 : index
    %4 = vector.load %arg3[%c0_3, %c0_4] : memref<1x128xf32, #tpu.memory_space<vmem>>, vector<1x128xf32>
    %5 = vector.broadcast %4 : vector<1x128xf32> to vector<512x128xf32>
    %6 = arith.addf %3, %5 : vector<512x128xf32>
    %cst = arith.constant 0.000000e+00 : f32
    %7 = vector.broadcast %cst : f32 to vector<512x128xf32>
    %8 = arith.maximumf %6, %7 : vector<512x128xf32>
    %c0_5 = arith.constant 0 : index
    %c0_6 = arith.constant 0 : index
    %9 = vector.load %arg4[%c0_5, %c0_6] : memref<512x128xf32, #tpu.memory_space<vmem>>, vector<512x128xf32>
    tpu.vector_store %arg4[%c0_5, %c0_6], %8 {strides = array<i32>} : memref<512x128xf32, #tpu.memory_space<vmem>>, vector<512x128xf32>,
    return
  }
  func.func @transform_0(%arg0: i32) -> (i32, i32) {
    %c0_i32 = arith.constant 0 : i32
    %c0_i32_0 = arith.constant 0 : i32
    return %arg0, %c0_i32 : i32, i32
  }
  func.func @transform_1(%arg0: i32) -> (i32, i32) {
    %c0_i32 = arith.constant 0 : i32
    %c0_i32_0 = arith.constant 0 : i32
    %c0_i32_1 = arith.constant 0 : i32
    return %c0_i32, %c0_i32_0 : i32, i32
  }
  func.func @transform_2(%arg0: i32) -> (i32, i32) {
    %c0_i32 = arith.constant 0 : i32
    %c0_i32_0 = arith.constant 0 : i32
    %c0_i32_1 = arith.constant 0 : i32
    return %c0_i32, %c0_i32_0 : i32, i32
  }
  func.func @transform_3(%arg0: i32) -> (i32, i32) {
    %c0_i32 = arith.constant 0 : i32
    %c0_i32_0 = arith.constant 0 : i32
    return %arg0, %c0_i32 : i32, i32
  }
}

</mosaic_0001>

<bundles_post_ra>
// kernel: conv_bn.3
= control target key start
LH: loop header
LB: loop body
LE: loop exit
PB: predicated region body
PF: predicated region fallthrough
CT: control target
= control target key end

     0   :  { %s748_s0 = inlined_call_operand.vmem [shape: f32[512,128], index: 0, kind: input, shape index: {}]   ;;  %s749_s1 = inlined_call_operand.vmem [shape: f32[1,128], index: 1, kind: input, shape index: {}]   ;;  %s750_s2 = inlined_call_operand.vmem [shape: f32[1,128], index: 2, kind: input, shape index: {}]   ;;  %s751_s3 = inlined_call_operand.hbm [shape: f32[512,128], index: 3, kind: output, shape index: {}]  }
   0x1   :  { %v15_v0 = vld [vmem:[%s748_s0] sm:$0xff]  ;;  %v16_v4 = vld [vmem:[%s748_s0 + $0x8] sm:$0xff]  ;;  %v17_v5 = vld [vmem:[%s748_s0 + $0x10] sm:$0xff] }
   0x2   :  { %v421_v1 = vld [vmem:[%s749_s1] ss:$0 sm:$0xff]  ;;  %v18_v6 = vld [vmem:[%s748_s0 + $0x18] sm:$0xff]  ;;  %v20_v11 = vld [vmem:[%s748_s0 + $0x28] sm:$0xff] }
   0x3   :  { %v426_v2 = vld [vmem:[%s750_s2] ss:$0 sm:$0xff]  ;;  %v86_v3 = vmul.f32 %v421_v1, %v15_v0  ;;  %v87_v7 = vmul.f32 %v421_v1, %v16_v4  ;;  %v88_v8 = vmul.f32 %v421_v1, %v17_v5  ;;  %v89_v9 = vmul.f32 %v421_v1, %v18_v6  ;;  %v21_v12 = vld [vmem:[%s748_s0 + $0x30] sm:$0xff]  ;;  %v22_v17 = vld [vmem:[%s748_s0 + $0x38] sm:$0xff] }
   0x4   :  { %v19_v10 = vld [vmem:[%s748_s0 + $0x20] sm:$0xff]  ;;  %v91_v15 = vmul.f32 %v421_v1, %v20_v11  ;;  %v92_v16 = vmul.f32 %v421_v1, %v21_v12  ;;  %v93_v21 = vmul.f32 %v421_v1, %v22_v17  ;;  %v24_v27 = vld [vmem:[%s748_s0 + $0x48] sm:$0xff]  ;;  %v25_v28 = vld [vmem:[%s748_s0 + $0x50] sm:$0xff] }
   0x5   :  { %v157_v13 = vadd.f32 %v426_v2, %v86_v3  ;;  %v90_v14 = vmul.f32 %v421_v1, %v19_v10  ;;  %v158_v18 = vadd.f32 %v426_v2, %v87_v7  ;;  %v159_v19 = vadd.f32 %v426_v2, %v88_v8  ;;  %v23_v22 = vld [vmem:[%s748_s0 + $0x40] sm:$0xff]  ;;  %v26_v29 = vld [vmem:[%s748_s0 + $0x58] sm:$0xff]  ;;  %v28_v35 = vld [vmem:[%s748_s0 + $0x68] sm:$0xff] }
   0x6   :  { %v160_v20 = vadd.f32 %v426_v2, %v89_v9  ;;  %v162_v25 = vadd.f32 %v426_v2, %v91_v15  ;;  %v163_v26 = vadd.f32 %v426_v2, %v92_v16  ;;  %v164_v33 = vadd.f32 %v426_v2, %v93_v21  ;;  %v27_v34 = vld [vmem:[%s748_s0 + $0x60] sm:$0xff]  ;;  %v29_v36 = vld [vmem:[%s748_s0 + $0x70] sm:$0xff]  ;;  %v30_v41 = vld [vmem:[%s748_s0 + $0x78] sm:$0xff] }
   0x7   :  { %v221_v23 = vmax.f32 %v157_v13, 0.0  ;;  %v161_v24 = vadd.f32 %v426_v2, %v90_v14  ;;  %v222_v30 = vmax.f32 %v158_v18, 0.0  ;;  %v223_v31 = vmax.f32 %v159_v19, 0.0  ;;  %v31_v54 = vld [vmem:[%s748_s0 + $0x80] sm:$0xff]  ;;  %v32_v59 = vld [vmem:[%s748_s0 + $0x88] sm:$0xff]  ;;  %v33_v60 = vld [vmem:[%s748_s0 + $0x90] sm:$0xff] }
   0x8   :  { %v224_v32 = vmax.f32 %v160_v20, 0.0  ;;  %v226_v38 = vmax.f32 %v162_v25, 0.0  ;;  %v227_v39 = vmax.f32 %v163_v26, 0.0  ;;  %v94_v40 = vmul.f32 %v421_v1, %v23_v22  ;;  %v34_v61 = vld [vmem:[%s748_s0 + $0x98] sm:$0xff]  ;;  %v35_v4 = vld [vmem:[%s748_s0 + $0xa0] sm:$0xff]  ;;  %v36_v5 = vld [vmem:[%s748_s0 + $0xa8] sm:$0xff] }
   0x9   :  { %285 = vst [vmem:[#allocation2] sm:$0xff] %v221_v23  ;;  %v225_v37 = vmax.f32 %v161_v24, 0.0  ;;  %286 = vst [vmem:[#allocation2 + $0x8] sm:$0xff] %v222_v30  ;;  %v228_v42 = vmax.f32 %v164_v33, 0.0  ;;  %v95_v43 = vmul.f32 %v421_v1, %v24_v27  ;;  %v96_v44 = vmul.f32 %v421_v1, %v25_v28  ;;  %v37_v6 = vld [vmem:[%s748_s0 + $0xb0] sm:$0xff]  ;;  %v38_v11 = vld [vmem:[%s748_s0 + $0xb8] sm:$0xff] }
   0xa   :  { %287 = vst [vmem:[#allocation2 + $0x10] sm:$0xff] %v223_v31  ;;  %288 = vst [vmem:[#allocation2 + $0x18] sm:$0xff] %v224_v32  ;;  %v97_v45 = vmul.f32 %v421_v1, %v26_v29  ;;  %v165_v46 = vadd.f32 %v426_v2, %v94_v40  ;;  %v98_v47 = vmul.f32 %v421_v1, %v27_v34  ;;  %v39_v24 = vld [vmem:[%s748_s0 + $0xc0] sm:$0xff]  ;;  %v40_v29 = vld [vmem:[%s748_s0 + $0xc8] sm:$0xff] }
   0xb   :  { %289 = vst [vmem:[#allocation2 + $0x20] sm:$0xff] %v225_v37  ;;  %290 = vst [vmem:[#allocation2 + $0x28] sm:$0xff] %v226_v38  ;;  %v99_v48 = vmul.f32 %v421_v1, %v28_v35  ;;  %v100_v49 = vmul.f32 %v421_v1, %v29_v36  ;;  %v166_v50 = vadd.f32 %v426_v2, %v95_v43  ;;  %v41_v30 = vld [vmem:[%s748_s0 + $0xd0] sm:$0xff]  ;;  %v42_v31 = vld [vmem:[%s748_s0 + $0xd8] sm:$0xff] }
   0xc   :  { %291 = vst [vmem:[#allocation2 + $0x30] sm:$0xff] %v227_v39  ;;  %292 = vst [vmem:[#allocation2 + $0x38] sm:$0xff] %v228_v42  ;;  %v167_v51 = vadd.f32 %v426_v2, %v96_v44  ;;  %v168_v52 = vadd.f32 %v426_v2, %v97_v45  ;;  %v101_v53 = vmul.f32 %v421_v1, %v30_v41  ;;  %v229_v55 = vmax.f32 %v165_v46, 0.0  ;;  %v43_v36 = vld [vmem:[%s748_s0 + $0xe0] sm:$0xff]  ;;  %v44_v37 = vld [vmem:[%s748_s0 + $0xe8] sm:$0xff] }
   0xd   :  { %v169_v56 = vadd.f32 %v426_v2, %v98_v47  ;;  %v170_v57 = vadd.f32 %v426_v2, %v99_v48  ;;  %v171_v58 = vadd.f32 %v426_v2, %v100_v49  ;;  %v230_v62 = vmax.f32 %v166_v50, 0.0  ;;  %v45_v38 = vld [vmem:[%s748_s0 + $0xf0] sm:$0xff]  ;;  %v46_v43 = vld [vmem:[%s748_s0 + $0xf8] sm:$0xff] }
   0xe   :  { %v231_v63 = vmax.f32 %v167_v51, 0.0  ;;  %v232_v0 = vmax.f32 %v168_v52, 0.0  ;;  %v172_v3 = vadd.f32 %v426_v2, %v101_v53  ;;  %293 = vst [vmem:[#allocation2 + $0x40] sm:$0xff] %v229_v55  ;;  %v102_v10 = vmul.f32 %v421_v1, %v31_v54 }
   0xf   :  { %v233_v7 = vmax.f32 %v169_v56, 0.0  ;;  %v234_v8 = vmax.f32 %v170_v57, 0.0  ;;  %v235_v9 = vmax.f32 %v171_v58, 0.0  ;;  %294 = vst [vmem:[#allocation2 + $0x48] sm:$0xff] %v230_v62  ;;  %v103_v13 = vmul.f32 %v421_v1, %v32_v59  ;;  %v47_v56 = vld [vmem:[%s748_s0 + $0x100] sm:$0xff] }
  0x10   :  { %295 = vst [vmem:[#allocation2 + $0x50] sm:$0xff] %v231_v63  ;;  %296 = vst [vmem:[#allocation2 + $0x58] sm:$0xff] %v232_v0  ;;  %v236_v12 = vmax.f32 %v172_v3, 0.0  ;;  %v104_v14 = vmul.f32 %v421_v1, %v33_v60  ;;  %v105_v15 = vmul.f32 %v421_v1, %v34_v61  ;;  %v173_v16 = vadd.f32 %v426_v2, %v102_v10 }
  0x11   :  { %297 = vst [vmem:[#allocation2 + $0x60] sm:$0xff] %v233_v7  ;;  %298 = vst [vmem:[#allocation2 + $0x68] sm:$0xff] %v234_v8  ;;  %v106_v17 = vmul.f32 %v421_v1, %v35_v4  ;;  %v107_v18 = vmul.f32 %v421_v1, %v36_v5  ;;  %v108_v19 = vmul.f32 %v421_v1, %v37_v6 }
  0x12   :  { %299 = vst [vmem:[#allocation2 + $0x70] sm:$0xff] %v235_v9  ;;  %300 = vst [vmem:[#allocation2 + $0x78] sm:$0xff] %v236_v12  ;;  %v174_v20 = vadd.f32 %v426_v2, %v103_v13  ;;  %v175_v21 = vadd.f32 %v426_v2, %v104_v14  ;;  %v176_v22 = vadd.f32 %v426_v2, %v105_v15  ;;  %v237_v25 = vmax.f32 %v173_v16, 0.0 }
  0x13   :  { %v109_v23 = vmul.f32 %v421_v1, %v38_v11  ;;  %v177_v26 = vadd.f32 %v426_v2, %v106_v17  ;;  %v178_v27 = vadd.f32 %v426_v2, %v107_v18  ;;  %v179_v28 = vadd.f32 %v426_v2, %v108_v19 }
  0x14   :  { %v238_v32 = vmax.f32 %v174_v20, 0.0  ;;  %v239_v33 = vmax.f32 %v175_v21, 0.0  ;;  %v240_v34 = vmax.f32 %v176_v22, 0.0  ;;  %301 = vst [vmem:[#allocation2 + $0x80] sm:$0xff] %v237_v25  ;;  %v110_v42 = vmul.f32 %v421_v1, %v39_v24 }
  0x15   :  { %v180_v35 = vadd.f32 %v426_v2, %v109_v23  ;;  %v241_v39 = vmax.f32 %v177_v26, 0.0  ;;  %v242_v40 = vmax.f32 %v178_v27, 0.0  ;;  %v243_v41 = vmax.f32 %v179_v28, 0.0 }
  0x16   :  { %302 = vst [vmem:[#allocation2 + $0x88] sm:$0xff] %v238_v32  ;;  %303 = vst [vmem:[#allocation2 + $0x90] sm:$0xff] %v239_v33  ;;  %v111_v45 = vmul.f32 %v421_v1, %v40_v29  ;;  %v112_v46 = vmul.f32 %v421_v1, %v41_v30  ;;  %v113_v47 = vmul.f32 %v421_v1, %v42_v31 }
  0x17   :  { %304 = vst [vmem:[#allocation2 + $0x98] sm:$0xff] %v240_v34  ;;  %v244_v44 = vmax.f32 %v180_v35, 0.0  ;;  %305 = vst [vmem:[#allocation2 + $0xa0] sm:$0xff] %v241_v39  ;;  %v181_v48 = vadd.f32 %v426_v2, %v110_v42  ;;  %v114_v49 = vmul.f32 %v421_v1, %v43_v36  ;;  %v115_v50 = vmul.f32 %v421_v1, %v44_v37 }
  0x18   :  { %306 = vst [vmem:[#allocation2 + $0xa8] sm:$0xff] %v242_v40  ;;  %307 = vst [vmem:[#allocation2 + $0xb0] sm:$0xff] %v243_v41  ;;  %v116_v51 = vmul.f32 %v421_v1, %v45_v38  ;;  %v182_v52 = vadd.f32 %v426_v2, %v111_v45  ;;  %v183_v53 = vadd.f32 %v426_v2, %v112_v46 }
  0x19   :  { %308 = vst [vmem:[#allocation2 + $0xb8] sm:$0xff] %v244_v44  ;;  %v184_v54 = vadd.f32 %v426_v2, %v113_v47  ;;  %v117_v55 = vmul.f32 %v421_v1, %v46_v43 }
  0x1a   :  { %8 = vsyncpa [#allocation3], 0  ;;  %v245_v57 = vmax.f32 %v181_v48, 0.0  ;;  %v185_v58 = vadd.f32 %v426_v2, %v114_v49  ;;  %v186_v59 = vadd.f32 %v426_v2, %v115_v50  ;;  %v187_v60 = vadd.f32 %v426_v2, %v116_v51  ;;  %v48_v61 = vld [vmem:[%s748_s0 + $0x108] sm:$0xff]  ;;  %v49_v62 = vld [vmem:[%s748_s0 + $0x110] sm:$0xff] }
  0x1b   :  { %v50_v63 = vld [vmem:[%s748_s0 + $0x118] sm:$0xff]  ;;  %v246_v0 = vmax.f32 %v182_v52, 0.0  ;;  %v247_v3 = vmax.f32 %v183_v53, 0.0  ;;  %v248_v4 = vmax.f32 %v184_v54, 0.0  ;;  %v188_v5 = vadd.f32 %v426_v2, %v117_v55  ;;  %v51_v6 = vld [vmem:[%s748_s0 + $0x120] sm:$0xff]  ;;  %v52_v7 = vld [vmem:[%s748_s0 + $0x128] sm:$0xff] }
  0x1c   :  { %v53_v8 = vld [vmem:[%s748_s0 + $0x130] sm:$0xff]  ;;  %309 = vst [vmem:[#allocation2 + $0xc0] sm:$0xff] %v245_v57  ;;  %v249_v9 = vmax.f32 %v185_v58, 0.0  ;;  %v250_v10 = vmax.f32 %v186_v59, 0.0  ;;  %v251_v11 = vmax.f32 %v187_v60, 0.0  ;;  %v118_v12 = vmul.f32 %v421_v1, %v47_v56  ;;  %v54_v13 = vld [vmem:[%s748_s0 + $0x138] sm:$0xff] }
  0x1d   :  { %310 = vst [vmem:[#allocation2 + $0xc8] sm:$0xff] %v246_v0  ;;  %311 = vst [vmem:[#allocation2 + $0xd0] sm:$0xff] %v247_v3  ;;  %v252_v14 = vmax.f32 %v188_v5, 0.0  ;;  %v119_v15 = vmul.f32 %v421_v1, %v48_v61  ;;  %v120_v16 = vmul.f32 %v421_v1, %v49_v62  ;;  %v121_v17 = vmul.f32 %v421_v1, %v50_v63  ;;  %v55_v26 = vld [vmem:[%s748_s0 + $0x140] sm:$0xff]  ;;  %v56_v31 = vld [vmem:[%s748_s0 + $0x148] sm:$0xff] }
  0x1e   :  { %312 = vst [vmem:[#allocation2 + $0xd8] sm:$0xff] %v248_v4  ;;  %313 = vst [vmem:[#allocation2 + $0xe0] sm:$0xff] %v249_v9  ;;  %v189_v18 = vadd.f32 %v426_v2, %v118_v12  ;;  %v122_v19 = vmul.f32 %v421_v1, %v51_v6  ;;  %v123_v20 = vmul.f32 %v421_v1, %v52_v7  ;;  %v57_v32 = vld [vmem:[%s748_s0 + $0x150] sm:$0xff]  ;;  %v58_v33 = vld [vmem:[%s748_s0 + $0x158] sm:$0xff] }
  0x1f   :  { %314 = vst [vmem:[#allocation2 + $0xe8] sm:$0xff] %v250_v10  ;;  %315 = vst [vmem:[#allocation2 + $0xf0] sm:$0xff] %v251_v11  ;;  %v124_v21 = vmul.f32 %v421_v1, %v53_v8  ;;  %v190_v22 = vadd.f32 %v426_v2, %v119_v15  ;;  %v191_v23 = vadd.f32 %v426_v2, %v120_v16  ;;  %v59_v38 = vld [vmem:[%s748_s0 + $0x160] sm:$0xff]  ;;  %v60_v39 = vld [vmem:[%s748_s0 + $0x168] sm:$0xff] }
  0x20   :  { %316 = vst [vmem:[#allocation2 + $0xf8] sm:$0xff] %v252_v14  ;;  %v192_v24 = vadd.f32 %v426_v2, %v121_v17  ;;  %v125_v25 = vmul.f32 %v421_v1, %v54_v13  ;;  %v253_v27 = vmax.f32 %v189_v18, 0.0  ;;  %v193_v28 = vadd.f32 %v426_v2, %v122_v19  ;;  %v61_v40 = vld [vmem:[%s748_s0 + $0x170] sm:$0xff]  ;;  %v62_v45 = vld [vmem:[%s748_s0 + $0x178] sm:$0xff]  ;;  %v63_v58 = vld [vmem:[%s748_s0 + $0x180] sm:$0xff] }
  0x21   :  { %v194_v29 = vadd.f32 %v426_v2, %v123_v20  ;;  %v195_v30 = vadd.f32 %v426_v2, %v124_v21  ;;  %v254_v34 = vmax.f32 %v190_v22, 0.0  ;;  %v255_v35 = vmax.f32 %v191_v23, 0.0  ;;  %v64_v63 = vld [vmem:[%s748_s0 + $0x188] sm:$0xff]  ;;  %v65_v0 = vld [vmem:[%s748_s0 + $0x190] sm:$0xff]  ;;  %v66_v3 = vld [vmem:[%s748_s0 + $0x198] sm:$0xff] }
  0x22   :  { %v256_v36 = vmax.f32 %v192_v24, 0.0  ;;  %v196_v37 = vadd.f32 %v426_v2, %v125_v25  ;;  %317 = vst [vmem:[#allocation2 + $0x100] sm:$0xff] %v253_v27  ;;  %v257_v41 = vmax.f32 %v193_v28, 0.0  ;;  %v126_v44 = vmul.f32 %v421_v1, %v55_v26  ;;  %v67_v8 = vld [vmem:[%s748_s0 + $0x1a0] sm:$0xff]  ;;  %v68_v9 = vld [vmem:[%s748_s0 + $0x1a8] sm:$0xff]  ;;  %v69_v10 = vld [vmem:[%s748_s0 + $0x1b0] sm:$0xff] }
  0x23   :  { %v258_v42 = vmax.f32 %v194_v29, 0.0  ;;  %v259_v43 = vmax.f32 %v195_v30, 0.0  ;;  %318 = vst [vmem:[#allocation2 + $0x108] sm:$0xff] %v254_v34  ;;  %319 = vst [vmem:[#allocation2 + $0x110] sm:$0xff] %v255_v35  ;;  %v127_v47 = vmul.f32 %v421_v1, %v56_v31  ;;  %v128_v48 = vmul.f32 %v421_v1, %v57_v32  ;;  %v70_v15 = vld [vmem:[%s748_s0 + $0x1b8] sm:$0xff]  ;;  %v71_v28 = vld [vmem:[%s748_s0 + $0x1c0] sm:$0xff] }
  0x24   :  { %320 = vst [vmem:[#allocation2 + $0x118] sm:$0xff] %v256_v36  ;;  %v260_v46 = vmax.f32 %v196_v37, 0.0  ;;  %v129_v49 = vmul.f32 %v421_v1, %v58_v33  ;;  %321 = vst [vmem:[#allocation2 + $0x120] sm:$0xff] %v257_v41  ;;  %v197_v50 = vadd.f32 %v426_v2, %v126_v44  ;;  %v130_v51 = vmul.f32 %v421_v1, %v59_v38  ;;  %v72_v33 = vld [vmem:[%s748_s0 + $0x1c8] sm:$0xff]  ;;  %v73_v34 = vld [vmem:[%s748_s0 + $0x1d0] sm:$0xff] }
  0x25   :  { %322 = vst [vmem:[#allocation2 + $0x128] sm:$0xff] %v258_v42  ;;  %323 = vst [vmem:[#allocation2 + $0x130] sm:$0xff] %v259_v43  ;;  %v131_v52 = vmul.f32 %v421_v1, %v60_v39  ;;  %v132_v53 = vmul.f32 %v421_v1, %v61_v40  ;;  %v198_v54 = vadd.f32 %v426_v2, %v127_v47  ;;  %v74_v35 = vld [vmem:[%s748_s0 + $0x1d8] sm:$0xff]  ;;  %v75_v40 = vld [vmem:[%s748_s0 + $0x1e0] sm:$0xff] }
  0x26   :  { %324 = vst [vmem:[#allocation2 + $0x138] sm:$0xff] %v260_v46  ;;  %v199_v55 = vadd.f32 %v426_v2, %v128_v48  ;;  %v200_v56 = vadd.f32 %v426_v2, %v129_v49  ;;  %v133_v57 = vmul.f32 %v421_v1, %v62_v45  ;;  %v261_v59 = vmax.f32 %v197_v50, 0.0  ;;  %v76_v41 = vld [vmem:[%s748_s0 + $0x1e8] sm:$0xff]  ;;  %v77_v42 = vld [vmem:[%s748_s0 + $0x1f0] sm:$0xff]  ;;  %v78_v47 = vld [vmem:[%s748_s0 + $0x1f8] sm:$0xff]  ;;  %s392_s0 = smov [#allocation2]  }
  0x27   :  { %v201_v60 = vadd.f32 %v426_v2, %v130_v51  ;;  %v202_v61 = vadd.f32 %v426_v2, %v131_v52  ;;  %v203_v62 = vadd.f32 %v426_v2, %v132_v53  ;;  %v262_v4 = vmax.f32 %v198_v54, 0.0  ;;  %s354_s26 = sshll.u32 %s392_s0, 4  ;;  %s355_s26 = int_to_ptr.vmem [resolvable:$true] %s354_s26 }
  0x28   :  { %v263_v5 = vmax.f32 %v199_v55, 0.0  ;;  %v264_v6 = vmax.f32 %v200_v56, 0.0  ;;  %v204_v7 = vadd.f32 %v426_v2, %v133_v57  ;;  %325 = vst [vmem:[#allocation2 + $0x140] sm:$0xff] %v261_v59  ;;  %v134_v14 = vmul.f32 %v421_v1, %v63_v58  ;;  %s370_s27 = scalar_lea.vmem %s355_s26, 8192  ;;  %p375_p1 = scmp.lt.s32.totalorder %s355_s26, %s355_s26 }
  0x29   :  { %v265_v11 = vmax.f32 %v201_v60, 0.0  ;;  %v266_v12 = vmax.f32 %v202_v61, 0.0  ;;  %v267_v13 = vmax.f32 %v203_v62, 0.0  ;;  %326 = vst [vmem:[#allocation2 + $0x148] sm:$0xff] %v262_v4  ;;  %v135_v17 = vmul.f32 %v421_v1, %v64_v63  ;;  %p371_p0 = scmp.ne.s32.totalorder %s355_s26, %s370_s27  ;;  %p376_p2 = scmp.lt.s32.totalorder %s370_s27, %s370_s27 }
  0x2a   :  { %327 = vst [vmem:[#allocation2 + $0x150] sm:$0xff] %v263_v5  ;;  %328 = vst [vmem:[#allocation2 + $0x158] sm:$0xff] %v264_v6  ;;  %v268_v16 = vmax.f32 %v204_v7, 0.0  ;;  %v136_v18 = vmul.f32 %v421_v1, %v65_v0  ;;  %v137_v19 = vmul.f32 %v421_v1, %v66_v3  ;;  %v205_v20 = vadd.f32 %v426_v2, %v134_v14 }
  0x2b   :  { %329 = vst [vmem:[#allocation2 + $0x160] sm:$0xff] %v265_v11  ;;  %330 = vst [vmem:[#allocation2 + $0x168] sm:$0xff] %v266_v12  ;;  %v138_v21 = vmul.f32 %v421_v1, %v67_v8  ;;  %v139_v22 = vmul.f32 %v421_v1, %v68_v9  ;;  %v140_v23 = vmul.f32 %v421_v1, %v69_v10  ;;  %p377_p3 = por %p376_p2, %p375_p1 }
  0x2c   :  { %331 = vst [vmem:[#allocation2 + $0x170] sm:$0xff] %v267_v13  ;;  %332 = vst [vmem:[#allocation2 + $0x178] sm:$0xff] %v268_v16  ;;  %v206_v24 = vadd.f32 %v426_v2, %v135_v17  ;;  %v207_v25 = vadd.f32 %v426_v2, %v136_v18  ;;  %v208_v26 = vadd.f32 %v426_v2, %v137_v19  ;;  %v269_v29 = vmax.f32 %v205_v20, 0.0 }
  0x2d   :  { %v141_v27 = vmul.f32 %v421_v1, %v70_v15  ;;  %v209_v30 = vadd.f32 %v426_v2, %v138_v21  ;;  %v210_v31 = vadd.f32 %v426_v2, %v139_v22  ;;  %v211_v32 = vadd.f32 %v426_v2, %v140_v23  ;;  %p378_p4 = pnand %p377_p3, %p371_p0 }
  0x2e   :  { %v270_v36 = vmax.f32 %v206_v24, 0.0  ;;  %v271_v37 = vmax.f32 %v207_v25, 0.0  ;;  %v272_v38 = vmax.f32 %v208_v26, 0.0  ;;  %333 = vst [vmem:[#allocation2 + $0x180] sm:$0xff] %v269_v29  ;;  %v142_v46 = vmul.f32 %v421_v1, %v71_v28 }
  0x2f   :  { %v212_v39 = vadd.f32 %v426_v2, %v141_v27  ;;  %v273_v43 = vmax.f32 %v209_v30, 0.0  ;;  %v274_v44 = vmax.f32 %v210_v31, 0.0  ;;  %v275_v45 = vmax.f32 %v211_v32, 0.0 }
  0x30   :  { %334 = vst [vmem:[#allocation2 + $0x188] sm:$0xff] %v270_v36  ;;  %335 = vst [vmem:[#allocation2 + $0x190] sm:$0xff] %v271_v37  ;;  %v143_v49 = vmul.f32 %v421_v1, %v72_v33  ;;  %v144_v50 = vmul.f32 %v421_v1, %v73_v34  ;;  %v145_v51 = vmul.f32 %v421_v1, %v74_v35 }
  0x31   :  { %336 = vst [vmem:[#allocation2 + $0x198] sm:$0xff] %v272_v38  ;;  %v276_v48 = vmax.f32 %v212_v39, 0.0  ;;  %337 = vst [vmem:[#allocation2 + $0x1a0] sm:$0xff] %v273_v43  ;;  %v213_v52 = vadd.f32 %v426_v2, %v142_v46  ;;  %v146_v53 = vmul.f32 %v421_v1, %v75_v40  ;;  %v147_v54 = vmul.f32 %v421_v1, %v76_v41 }
  0x32   :  { %338 = vst [vmem:[#allocation2 + $0x1a8] sm:$0xff] %v274_v44  ;;  %339 = vst [vmem:[#allocation2 + $0x1b0] sm:$0xff] %v275_v45  ;;  %v148_v55 = vmul.f32 %v421_v1, %v77_v42  ;;  %v214_v56 = vadd.f32 %v426_v2, %v143_v49  ;;  %v215_v57 = vadd.f32 %v426_v2, %v144_v50 }
  0x33   :  { %340 = vst [vmem:[#allocation2 + $0x1b8] sm:$0xff] %v276_v48  ;;  %v216_v58 = vadd.f32 %v426_v2, %v145_v51  ;;  %v149_v59 = vmul.f32 %v421_v1, %v78_v47  ;;  %v277_v60 = vmax.f32 %v213_v52, 0.0  ;;  %v217_v61 = vadd.f32 %v426_v2, %v146_v53 }
  0x34   :  { %v218_v62 = vadd.f32 %v426_v2, %v147_v54  ;;  %v219_v63 = vadd.f32 %v426_v2, %v148_v55  ;;  %v278_v0 = vmax.f32 %v214_v56, 0.0  ;;  %v279_v3 = vmax.f32 %v215_v57, 0.0 }
  0x35   :  { %v280_v4 = vmax.f32 %v216_v58, 0.0  ;;  %v220_v5 = vadd.f32 %v426_v2, %v149_v59  ;;  %341 = vst [vmem:[#allocation2 + $0x1c0] sm:$0xff] %v277_v60  ;;  %v281_v6 = vmax.f32 %v217_v61, 0.0 }
  0x36   :  { %v282_v7 = vmax.f32 %v218_v62, 0.0  ;;  %v283_v8 = vmax.f32 %v219_v63, 0.0  ;;  %342 = vst [vmem:[#allocation2 + $0x1c8] sm:$0xff] %v278_v0  ;;  %343 = vst [vmem:[#allocation2 + $0x1d0] sm:$0xff] %v279_v3 }
  0x37   :  { %344 = vst [vmem:[#allocation2 + $0x1d8] sm:$0xff] %v280_v4  ;;  %v284_v1 = vmax.f32 %v220_v5, 0.0  ;;  %345 = vst [vmem:[#allocation2 + $0x1e0] sm:$0xff] %v281_v6 }
  0x38   :  { %346 = vst [vmem:[#allocation2 + $0x1e8] sm:$0xff] %v282_v7  ;;  %347 = vst [vmem:[#allocation2 + $0x1f0] sm:$0xff] %v283_v8 }
  0x39   :  { %348 = vst [vmem:[#allocation2 + $0x1f8] sm:$0xff] %v284_v1 }
  0x3a   :  { %381 = shalt.err (!%p378_p4)
}
  0x3b   :  { %s393_s28 = smov 128   ;;  %s394_s29 = smov 8  }
  0x3c   :  { %360 = dma.vmem_to_hbm [thread:$0]  %s355_s26, 8192, %s751_s3, [#allocation3], %s393_s28, %s393_s28, %s394_s29  }
  0x3d   :  { %390 = dma.done.wait [#allocation3], 8192  }
  0x3e   :  { %391 = vsyncadd [#allocation3], 4294959104 }
  0x3f   :  { %364 = vsyncpa [#allocation3], 1 }

// kernel: conv_bn.2
= control target key start
LH: loop header
LB: loop body
LE: loop exit
PB: predicated region body
PF: predicated region fallthrough
CT: control target
= control target key end

     0   :  { %s1578_s15 = smov 0   ;;  %s1580_s16 = smov 0   ;;  %s1936_s0 = inlined_call_operand.vmem [shape: bf16[512,256], index: 0, kind: input, shape index: {}]   ;;  %s1937_s1 = inlined_call_operand.vmem [shape: bf16[256,128], index: 1, kind: input, shape index: {}]   ;;  %s1938_s2 = inlined_call_operand.vmem [shape: f32[512,128], index: 2, kind: output, shape index: {0}]   ;;  %s1939_s3 = inlined_call_operand.vmem [shape: f32[1,128], index: 3, kind: output, shape index: {1}]   ;;  %s1940_s4 = inlined_call_operand.vmem [shape: f32[1,128], index: 4, kind: output, shape index: {2}]  }
   0x1   :  { %s1582_s17 = smov 0  }
   0x2 LB: > { %s30_s18 = sadd.s32 1, %s1545_s16  ;;  %p1248_p0 = scmp.ge.s32.totalorder %s1549_s17, 1  ;;  %s1549_s17 = sphi %s1582_s17, %s15_s17   ;;  %s1545_s16 = sphi %s1580_s16, %s1943_s16   ;;  %s1541_s15 = sphi %s1578_s15, %s1942_s15  }
   0x3   : > { %p32_p1 = scmp.ge.s32.totalorder %s30_s18, 2  ;;  %p213_p2 = scmp.lt.s32.totalorder %s1549_s17, 3 }
   0x5   : > { %s1945_s18 = smov (%p32_p1, %s30_s18), 0  ;;  %p214_p3 = pnand %p1248_p0, %p213_p2 }
   0x6   : > { %s1249_s19 = sshll.u32 (!%p214_p3), %s1541_s15, 5  ;;  %p334_p4 = scmp.eq.s32.totalorder (!%p214_p3), %s1541_s15, 0 }
   0x7   : > { %217 = sbr.rel (%p214_p3) target bundleno = 373 (0x175), region = 28  ;;  %p1602_p5 = scmp.lt.s32.totalorder (!%p214_p3), %s1249_s19, 63 }
   0xc   : > { %v1551_v0 = vmov 0.0   ;;  %s1947_s19 = smov (!%p1602_p5, %s1249_s19), 63  ;;  %v1552_v1 = vmov (%p334_p4), 0.0  }
   0xd   : > { %302 = vst [vmem:[#allocation2 + $0xb0] sm:$0xff] %v1551_v0  ;;  %303 = vst [vmem:[#allocation2] sm:$0xff] %v1551_v0  ;;  %s1307_s21 = sshll.u32 %s1947_s19, 3 }
   0xe   : > { %304 = vst [vmem:[#allocation2 + $0xd8] sm:$0xff] %v1551_v0  ;;  %305 = vst [vmem:[#allocation2 + $0x18] sm:$0xff] %v1551_v0  ;;  %s1613_s24 = scalar_lea.vmem %s1936_s0, %s1307_s21  ;;  %s1618_s27 = scalar_lea.vmem %s1938_s2, %s1307_s21 }
   0xf   : > { %306 = vst [vmem:[#allocation2 + $0x50] sm:$0xff] %v1551_v0  ;;  %307 = vst [vmem:[#allocation2 + $0x68] sm:$0xff] %v1551_v0 }
  0x10   : > { %308 = vst [vmem:[#allocation2 + $0x30] sm:$0xff] %v1551_v0  ;;  %309 = vst [vmem:[#allocation2 + $0x48] sm:$0xff] %v1551_v0 }
  0x11   : > { %310 = vst [vmem:[#allocation2 + $0x80] sm:$0xff] %v1551_v0  ;;  %311 = vst [vmem:[#allocation2 + $0x88] sm:$0xff] %v1551_v0 }
  0x12   : > { %312 = vst [vmem:[#allocation2 + $0xe8] sm:$0xff] %v1551_v0  ;;  %313 = vst [vmem:[#allocation2 + $0xb8] sm:$0xff] %v1551_v0 }
  0x13   : > { %314 = vst [vmem:[#allocation2 + $0x60] sm:$0xff] %v1551_v0  ;;  %315 = vst [vmem:[#allocation2 + $0xf0] sm:$0xff] %v1551_v0 }
  0x14   : > { %316 = vst [vmem:[#allocation2 + $0x8] sm:$0xff] %v1551_v0  ;;  %317 = vst [vmem:[#allocation2 + $0x78] sm:$0xff] %v1551_v0 }
  0x15   : > { %318 = vst [vmem:[#allocation2 + $0x38] sm:$0xff] %v1551_v0  ;;  %319 = vst [vmem:[#allocation2 + $0x58] sm:$0xff] %v1551_v0 }
  0x16   : > { %320 = vst [vmem:[#allocation2 + $0x40] sm:$0xff] %v1551_v0  ;;  %321 = vst [vmem:[#allocation2 + $0xc8] sm:$0xff] %v1551_v0 }
  0x17   : > { %322 = vst [vmem:[#allocation2 + $0xe0] sm:$0xff] %v1551_v0  ;;  %323 = vst [vmem:[#allocation2 + $0x90] sm:$0xff] %v1551_v0 }
  0x18   : > { %324 = vst [vmem:[#allocation2 + $0x70] sm:$0xff] %v1551_v0  ;;  %325 = vst [vmem:[#allocation2 + $0xc0] sm:$0xff] %v1551_v0  ;;  %338 = sbr.rel (!%p334_p4) target bundleno = 30 (0x1e), region = 36 }
  0x19   : > { %326 = vst [vmem:[#allocation2 + $0xa8] sm:$0xff] %v1551_v0  ;;  %327 = vst [vmem:[#allocation2 + $0xd0] sm:$0xff] %v1551_v0 }
  0x1a   : > { %328 = vst [vmem:[#allocation2 + $0x10] sm:$0xff] %v1551_v0  ;;  %329 = vst [vmem:[#allocation2 + $0x28] sm:$0xff] %v1551_v0 }
  0x1b   : > { %330 = vst [vmem:[#allocation2 + $0xa0] sm:$0xff] %v1551_v0  ;;  %331 = vst [vmem:[#allocation2 + $0xf8] sm:$0xff] %v1551_v0 }
  0x1c   : > { %332 = vst [vmem:[#allocation2 + $0x20] sm:$0xff] %v1551_v0  ;;  %333 = vst [vmem:[#allocation2 + $0x98] sm:$0xff] %v1551_v0 }
  0x1d   : > { %339 = vst [vmem:[%s1939_s3] sm:$0x1] %v1552_v1  ;;  %340 = vst [vmem:[%s1940_s4] sm:$0x1] %v1552_v1 }
  0x1e PF: > { %v1463_v2 = vld [vmem:[%s1937_s1 + $0x78] sm:$0xff]   ;;  %v1465_v4 = vld [vmem:[%s1937_s1 + $0x70] sm:$0xff]   ;;  %v1467_v6 = vld [vmem:[%s1937_s1 + $0x68] sm:$0xff]  }
  0x1f   : > { %v1464_v3 = vld [vmem:[%s1937_s1 + $0x38] sm:$0xff]   ;;  %1309 = vmatprep.subr.bf16.mxu0 %v1463_v2  ;;  %1421 = vmatprep.subr.bf16.mxu1 %v1463_v2  ;;  %v1466_v5 = vld [vmem:[%s1937_s1 + $0x30] sm:$0xff]   ;;  %v1468_v7 = vld [vmem:[%s1937_s1 + $0x28] sm:$0xff]  }
  0x20   : > { %1310 = vmatpush3.bf16.msra.mxu0 %v1464_v3  ;;  %1429 = vmatpush3.bf16.msra.mxu1 %v1464_v3  ;;  %v1469_v8 = vld [vmem:[%s1937_s1 + $0x60] sm:$0xff]   ;;  %v1471_v10 = vld [vmem:[%s1937_s1 + $0x58] sm:$0xff]   ;;  %v1473_v12 = vld [vmem:[%s1937_s1 + $0x50] sm:$0xff]  }
  0x21   : > { %1311 = vmatprep.subr.bf16.mxu0 %v1465_v4  ;;  %1422 = vmatprep.subr.bf16.mxu1 %v1465_v4  ;;  %v1470_v9 = vld [vmem:[%s1937_s1 + $0x20] sm:$0xff]   ;;  %v1472_v11 = vld [vmem:[%s1937_s1 + $0x18] sm:$0xff]   ;;  %v1474_v14 = vld [vmem:[%s1937_s1 + $0x10] sm:$0xff]  }
  0x22   : > { %v1481_v13 = vld [vmem:[%s1613_s24 + $0x4] ss:$8 sps:$4 sm:$0xff]   ;;  %v1479_v20 = vld [vmem:[%s1613_s24] ss:$8 sps:$4 sm:$0xff]   ;;  %v1482_v21 = vld [vmem:[%s1613_s24 + $0x14] ss:$8 sps:$4 sm:$0xff]  }
  0x23   : > { %725 = vmatprep.mubr.bf16.mxu0 %v1481_v13  ;;  %v1475_v15 = vld [vmem:[%s1937_s1 + $0x48] sm:$0xff]   ;;  %v1477_v18 = vld [vmem:[%s1937_s1 + $0x40] sm:$0xff]   ;;  %v1497_v23 = vld [vmem:[%s1613_s24 + $0x94] ss:$8 sps:$4 sm:$0xff]  }
  0x24   : > { %1312 = vmatpush3.bf16.msra.mxu0 %v1466_v5  ;;  %1430 = vmatpush3.bf16.msra.mxu1 %v1466_v5  ;;  %v1493_v16 = vld [vmem:[%s1613_s24 + $0x84] ss:$8 sps:$4 sm:$0xff]   ;;  %v1491_v22 = vld [vmem:[%s1613_s24 + $0x80] ss:$8 sps:$4 sm:$0xff]   ;;  %v1484_v24 = vld [vmem:[%s1613_s24 + $0x10] ss:$8 sps:$4 sm:$0xff]  }
  0x25   : > { %1313 = vmatprep.subr.bf16.mxu0 %v1467_v6  ;;  %1423 = vmatprep.subr.bf16.mxu1 %v1467_v6  ;;  %v1476_v17 = vld [vmem:[%s1937_s1 + $0x8] sm:$0xff]   ;;  %v1478_v19 = vld [vmem:[%s1937_s1] sm:$0xff]   ;;  %v1499_v26 = vld [vmem:[%s1613_s24 + $0x90] ss:$8 sps:$4 sm:$0xff]  }
  0x26   : > { %789 = vmatprep.mubr.bf16.mxu1 %v1493_v16  ;;  %v1485_v25 = vld [vmem:[%s1613_s24 + $0x24] ss:$8 sps:$4 sm:$0xff]   ;;  %v1487_v28 = vld [vmem:[%s1613_s24 + $0x20] ss:$8 sps:$4 sm:$0xff]   ;;  %v1488_v29 = vld [vmem:[%s1613_s24 + $0x34] ss:$8 sps:$4 sm:$0xff]  }
  0x27   : > { %v1503_v27 = vld [vmem:[%s1613_s24 + $0xa4] ss:$8 sps:$4 sm:$0xff]   ;;  %v1505_v30 = vld [vmem:[%s1613_s24 + $0xa0] ss:$8 sps:$4 sm:$0xff]   ;;  %v1509_v31 = vld [vmem:[%s1613_s24 + $0xb4] ss:$8 sps:$4 sm:$0xff]  }
  0x28   : > { %1314 = vmatpush3.bf16.msra.mxu0 %v1468_v7  ;;  %1431 = vmatpush3.bf16.msra.mxu1 %v1468_v7  ;;  %v1490_v32 = vld [vmem:[%s1613_s24 + $0x30] ss:$8 sps:$4 sm:$0xff]   ;;  %v1494_v33 = vld [vmem:[%s1613_s24 + $0x44] ss:$8 sps:$4 sm:$0xff]   ;;  %v1496_v36 = vld [vmem:[%s1613_s24 + $0x40] ss:$8 sps:$4 sm:$0xff]  }
  0x29   : > { %1315 = vmatprep.subr.bf16.mxu0 %v1469_v8  ;;  %1424 = vmatprep.subr.bf16.mxu1 %v1469_v8  ;;  %v1511_v34 = vld [vmem:[%s1613_s24 + $0xb0] ss:$8 sps:$4 sm:$0xff]   ;;  %v1515_v35 = vld [vmem:[%s1613_s24 + $0xc4] ss:$8 sps:$4 sm:$0xff]   ;;  %v1500_v37 = vld [vmem:[%s1613_s24 + $0x54] ss:$8 sps:$4 sm:$0xff]  }
  0x2a   : > { %v1517_v38 = vld [vmem:[%s1613_s24 + $0xc0] ss:$8 sps:$4 sm:$0xff]   ;;  %v1518_v39 = vld [vmem:[%s1613_s24 + $0xd4] ss:$8 sps:$4 sm:$0xff]   ;;  %v1502_v40 = vld [vmem:[%s1613_s24 + $0x50] ss:$8 sps:$4 sm:$0xff]  }
  0x2b   : > { %v1506_v41 = vld [vmem:[%s1613_s24 + $0x64] ss:$8 sps:$4 sm:$0xff]   ;;  %v1520_v42 = vld [vmem:[%s1613_s24 + $0xd0] ss:$8 sps:$4 sm:$0xff]   ;;  %v1508_v44 = vld [vmem:[%s1613_s24 + $0x60] ss:$8 sps:$4 sm:$0xff]  }
  0x2c   : > { %1316 = vmatpush3.bf16.msra.mxu0 %v1470_v9  ;;  %1432 = vmatpush3.bf16.msra.mxu1 %v1470_v9  ;;  %v1521_v43 = vld [vmem:[%s1613_s24 + $0xe4] ss:$8 sps:$4 sm:$0xff]   ;;  %v1512_v45 = vld [vmem:[%s1613_s24 + $0x74] ss:$8 sps:$4 sm:$0xff]   ;;  %v1523_v46 = vld [vmem:[%s1613_s24 + $0xe0] ss:$8 sps:$4 sm:$0xff]  }
  0x2d   : > { %1317 = vmatprep.subr.bf16.mxu0 %v1471_v10  ;;  %1425 = vmatprep.subr.bf16.mxu1 %v1471_v10  ;;  %v1524_v47 = vld [vmem:[%s1613_s24 + $0xf4] ss:$8 sps:$4 sm:$0xff]   ;;  %v1514_v48 = vld [vmem:[%s1613_s24 + $0x70] ss:$8 sps:$4 sm:$0xff]   ;;  %v342_v61 = vld [vmem:[#allocation2] sm:$0xff] }
  0x2e   : > { %v1526_v49 = vld [vmem:[%s1613_s24 + $0xf0] ss:$8 sps:$4 sm:$0xff]  }
  0x2f   : > { %v341_v52 = vld [vmem:[#allocation2 + $0xb0] sm:$0xff]  ;;  %v357_v55 = vld [vmem:[#allocation2 + $0x38] sm:$0xff] }
  0x30   : > { %1318 = vmatpush3.bf16.msra.mxu0 %v1472_v11  ;;  %1433 = vmatpush3.bf16.msra.mxu1 %v1472_v11  ;;  %v358_v1 = vld [vmem:[#allocation2 + $0x58] sm:$0xff]  ;;  %v359_v11 = vld [vmem:[#allocation2 + $0x40] sm:$0xff] }
  0x31   : > { %1319 = vmatprep.subr.bf16.mxu0 %v1473_v12  ;;  %1426 = vmatprep.subr.bf16.mxu1 %v1473_v12  ;;  %v343_v7 = vld [vmem:[#allocation2 + $0xd8] sm:$0xff] }
  0x34   : > { %1320 = vmatpush3.bf16.msra.mxu0 %v1474_v14  ;;  %1434 = vmatpush3.bf16.msra.mxu1 %v1474_v14 }
  0x35   : > { %1321 = vmatprep.subr.bf16.mxu0 %v1475_v15  ;;  %1427 = vmatprep.subr.bf16.mxu1 %v1475_v15 }
  0x38   : > { %1322 = vmatpush3.bf16.msra.mxu0 %v1476_v17  ;;  %1435 = vmatpush3.bf16.msra.mxu1 %v1476_v17  ;;  %v344_v17 = vld [vmem:[#allocation2 + $0x18] sm:$0xff] }
  0x39   : > { %1323 = vmatprep.subr.bf16.mxu0 %v1477_v18  ;;  %1428 = vmatprep.subr.bf16.mxu1 %v1477_v18 }
  0x3c   : > { %1324 = vmatpush3.bf16.msra.mxu0 %v1478_v19  ;;  %1436 = vmatpush3.bf16.msra.mxu1 %v1478_v19 }
  0x3f   : > { %726 = vmatmul.mubr.bf16.vlgmr.msra.gmra.mxu0 %v1479_v20  ;;  %790 = vmatmul.mubr.bf16.vlgmr.msra.gmra.mxu1 %v1491_v22 }
  0x40   : > { %733 = vmatprep.mubr.bf16.mxu0 %v1482_v21  ;;  %797 = vmatprep.mubr.bf16.mxu1 %v1497_v23  ;;  %v360_v21 = vld [vmem:[#allocation2 + $0xc8] sm:$0xff] }
  0x47   : > { %734 = vmatmul.mubr.bf16.gmra.mxu0 %v1484_v24  ;;  %798 = vmatmul.mubr.bf16.gmra.mxu1 %v1499_v26 }
  0x48   : > { %741 = vmatprep.mubr.bf16.mxu0 %v1485_v25  ;;  %805 = vmatprep.mubr.bf16.mxu1 %v1503_v27  ;;  %v345_v27 = vld [vmem:[#allocation2 + $0x50] sm:$0xff] }
  0x4f   : > { %742 = vmatmul.mubr.bf16.gmra.mxu0 %v1487_v28  ;;  %806 = vmatmul.mubr.bf16.gmra.mxu1 %v1505_v30 }
  0x50   : > { %749 = vmatprep.mubr.bf16.mxu0 %v1488_v29  ;;  %813 = vmatprep.mubr.bf16.mxu1 %v1509_v31  ;;  %v361_v31 = vld [vmem:[#allocation2 + $0xe0] sm:$0xff] }
  0x57   : > { %750 = vmatmul.mubr.bf16.gmra.mxu0 %v1490_v32  ;;  %814 = vmatmul.mubr.bf16.gmra.mxu1 %v1511_v34 }
  0x58   : > { %757 = vmatprep.mubr.bf16.mxu0 %v1494_v33  ;;  %821 = vmatprep.mubr.bf16.mxu1 %v1515_v35 }
  0x5f   : > { %758 = vmatmul.mubr.bf16.gmra.mxu0 %v1496_v36  ;;  %822 = vmatmul.mubr.bf16.gmra.mxu1 %v1517_v38 }
  0x60   : > { %765 = vmatprep.mubr.bf16.mxu0 %v1500_v37  ;;  %829 = vmatprep.mubr.bf16.mxu1 %v1518_v39  ;;  %v346_v37 = vld [vmem:[#allocation2 + $0x68] sm:$0xff] }
  0x67   : > { %766 = vmatmul.mubr.bf16.gmra.mxu0 %v1502_v40  ;;  %830 = vmatmul.mubr.bf16.gmra.mxu1 %v1520_v42 }
  0x68   : > { %773 = vmatprep.mubr.bf16.mxu0 %v1506_v41  ;;  %837 = vmatprep.mubr.bf16.mxu1 %v1521_v43  ;;  %v362_v41 = vld [vmem:[#allocation2 + $0x90] sm:$0xff] }
  0x6f   : > { %774 = vmatmul.mubr.bf16.gmra.mxu0 %v1508_v44  ;;  %838 = vmatmul.mubr.bf16.gmra.mxu1 %v1523_v46 }
  0x70   : > { %781 = vmatprep.mubr.bf16.mxu0 %v1512_v45  ;;  %845 = vmatprep.mubr.bf16.mxu1 %v1524_v47  ;;  %v347_v47 = vld [vmem:[#allocation2 + $0x30] sm:$0xff] }
  0x77   : > { %782 = vmatmul.mubr.bf16.gmra.mxu0 %v1514_v48  ;;  %846 = vmatmul.mubr.bf16.gmra.mxu1 %v1526_v49 }
  0xff   : > { %v1325_v50 = vpop.f32.mrf.mxu0  ;;  %v1373_v51 = vpop.f32.mrf.mxu1 }
 0x101   : > { %v1326_v53 = vpop.f32.mrf.mxu0  ;;  %v1374_v56 = vpop.f32.mrf.mxu1 }
 0x102   : > { %v1327_v54 = vadd.f32 %v1326_v53, %v1325_v50  ;;  %v1375_v58 = vadd.f32 %v1374_v56, %v1373_v51  ;;  %v363_v51 = vld [vmem:[#allocation2 + $0x70] sm:$0xff] }
 0x103   : > { %v1328_v57 = vpop.f32.mrf.mxu0  ;;  %v1376_v60 = vpop.f32.mrf.mxu1 }
 0x104   : > { %v1708_v59 = vadd.f32 %v1327_v54, %v341_v52  ;;  %v1710_v63 = vadd.f32 %v1375_v58, %v357_v55 }
 0x105   : > { %v1329_v62 = vpop.f32.mrf.mxu0  ;;  %v1377_v2 = vpop.f32.mrf.mxu1 }
 0x106   : > { %886 = vst [vmem:[#allocation2 + $0xb0] sm:$0xff] %v1708_v59  ;;  %953 = vst [vmem:[%s1618_s27] sm:$0xff] %v1708_v59  ;;  %v1330_v0 = vadd.f32 %v1329_v62, %v1328_v57  ;;  %v1378_v4 = vadd.f32 %v1377_v2, %v1376_v60  ;;  %v348_v57 = vld [vmem:[#allocation2 + $0x48] sm:$0xff]  ;;  %v364_v62 = vld [vmem:[#allocation2 + $0xc0] sm:$0xff] }
 0x107   : > { %v1331_v3 = vpop.f32.mrf.mxu0  ;;  %902 = vst [vmem:[#allocation2 + $0x38] sm:$0xff] %v1710_v63  ;;  %969 = vst [vmem:[%s1618_s27 + $0x80] sm:$0xff] %v1710_v63  ;;  %v1379_v6 = vpop.f32.mrf.mxu1 }
 0x108   : > { %v1718_v5 = vadd.f32 %v1330_v0, %v342_v61  ;;  %v1720_v9 = vadd.f32 %v1378_v4, %v358_v1 }
 0x109   : > { %v1332_v8 = vpop.f32.mrf.mxu0  ;;  %v1380_v12 = vpop.f32.mrf.mxu1 }
 0x10a   : > { %887 = vst [vmem:[#allocation2] sm:$0xff] %v1718_v5  ;;  %954 = vst [vmem:[%s1618_s27 + $0x8] sm:$0xff] %v1718_v5  ;;  %v1333_v10 = vadd.f32 %v1332_v8, %v1331_v3  ;;  %v1381_v14 = vadd.f32 %v1380_v12, %v1379_v6  ;;  %v349_v6 = vld [vmem:[#allocation2 + $0x80] sm:$0xff] }
 0x10b   : > { %v1334_v13 = vpop.f32.mrf.mxu0  ;;  %903 = vst [vmem:[#allocation2 + $0x58] sm:$0xff] %v1720_v9  ;;  %970 = vst [vmem:[%s1618_s27 + $0x88] sm:$0xff] %v1720_v9  ;;  %v1382_v16 = vpop.f32.mrf.mxu1 }
 0x10c   : > { %v1728_v15 = vadd.f32 %v1333_v10, %v343_v7  ;;  %v1730_v19 = vadd.f32 %v1381_v14, %v359_v11  ;;  %v365_v11 = vld [vmem:[#allocation2 + $0xa8] sm:$0xff] }
 0x10d   : > { %v1335_v18 = vpop.f32.mrf.mxu0  ;;  %v1383_v22 = vpop.f32.mrf.mxu1 }
 0x10e   : > { %888 = vst [vmem:[#allocation2 + $0xd8] sm:$0xff] %v1728_v15  ;;  %955 = vst [vmem:[%s1618_s27 + $0x10] sm:$0xff] %v1728_v15  ;;  %v1336_v20 = vadd.f32 %v1335_v18, %v1334_v13  ;;  %v1384_v24 = vadd.f32 %v1383_v22, %v1382_v16  ;;  %v1027_v16 = vmul.f32 %v1718_v5, %v1718_v5 }
 0x10f   : > { %v1337_v23 = vpop.f32.mrf.mxu0  ;;  %904 = vst [vmem:[#allocation2 + $0x40] sm:$0xff] %v1730_v19  ;;  %971 = vst [vmem:[%s1618_s27 + $0x90] sm:$0xff] %v1730_v19  ;;  %v1385_v26 = vpop.f32.mrf.mxu1 }
 0x110   : > { %v1738_v25 = vadd.f32 %v1336_v20, %v344_v17  ;;  %v1740_v29 = vadd.f32 %v1384_v24, %v360_v21  ;;  %v350_v20 = vld [vmem:[#allocation2 + $0x88] sm:$0xff]  ;;  %v986_v24 = vadd.f32 %v1718_v5, %v1708_v59 }
 0x111   : > { %v1338_v28 = vpop.f32.mrf.mxu0  ;;  %v1386_v32 = vpop.f32.mrf.mxu1 }
 0x112   : > { %889 = vst [vmem:[#allocation2 + $0x18] sm:$0xff] %v1738_v25  ;;  %956 = vst [vmem:[%s1618_s27 + $0x18] sm:$0xff] %v1738_v25  ;;  %v1339_v30 = vadd.f32 %v1338_v28, %v1337_v23  ;;  %v1387_v34 = vadd.f32 %v1386_v32, %v1385_v26  ;;  %v1026_v23 = vmul.f32 %v1708_v59, %v1708_v59  ;;  %v366_v28 = vld [vmem:[#allocation2 + $0xd0] sm:$0xff] }
 0x113   : > { %v1340_v33 = vpop.f32.mrf.mxu0  ;;  %905 = vst [vmem:[#allocation2 + $0xc8] sm:$0xff] %v1740_v29  ;;  %972 = vst [vmem:[%s1618_s27 + $0x98] sm:$0xff] %v1740_v29  ;;  %v1388_v36 = vpop.f32.mrf.mxu1  ;;  %v1028_v26 = vmul.f32 %v1728_v15, %v1728_v15  ;;  %v987_v59 = vadd.f32 %v986_v24, %v1728_v15  ;;  %v1029_v5 = vmul.f32 %v1738_v25, %v1738_v25 }
 0x114   : > { %v1748_v35 = vadd.f32 %v1339_v30, %v345_v27  ;;  %v1750_v39 = vadd.f32 %v1387_v34, %v361_v31 }
 0x115   : > { %v1341_v38 = vpop.f32.mrf.mxu0  ;;  %v1389_v42 = vpop.f32.mrf.mxu1 }
 0x116   : > { %890 = vst [vmem:[#allocation2 + $0x50] sm:$0xff] %v1748_v35  ;;  %957 = vst [vmem:[%s1618_s27 + $0x20] sm:$0xff] %v1748_v35  ;;  %v1342_v40 = vadd.f32 %v1341_v38, %v1340_v33  ;;  %v1390_v44 = vadd.f32 %v1389_v42, %v1388_v36  ;;  %v1058_v33 = vadd.f32 %v1027_v16, %v1026_v23 }
 0x117   : > { %v1343_v43 = vpop.f32.mrf.mxu0  ;;  %906 = vst [vmem:[#allocation2 + $0xe0] sm:$0xff] %v1750_v39  ;;  %973 = vst [vmem:[%s1618_s27 + $0xa0] sm:$0xff] %v1750_v39  ;;  %v1391_v46 = vpop.f32.mrf.mxu1  ;;  %v988_v42 = vadd.f32 %v987_v59, %v1738_v25 }
 0x118   : > { %v1758_v45 = vadd.f32 %v1342_v40, %v346_v37  ;;  %v1760_v49 = vadd.f32 %v1390_v44, %v362_v41  ;;  %v351_v37 = vld [vmem:[#allocation2 + $0xe8] sm:$0xff]  ;;  %v1059_v41 = vadd.f32 %v1058_v33, %v1028_v26  ;;  %v367_v44 = vld [vmem:[#allocation2 + $0x10] sm:$0xff] }
 0x119   : > { %v1344_v48 = vpop.f32.mrf.mxu0  ;;  %v1392_v52 = vpop.f32.mrf.mxu1  ;;  %v989_v25 = vadd.f32 %v988_v42, %v1748_v35 }
 0x11a   : > { %891 = vst [vmem:[#allocation2 + $0x68] sm:$0xff] %v1758_v45  ;;  %958 = vst [vmem:[%s1618_s27 + $0x28] sm:$0xff] %v1758_v45  ;;  %v1345_v50 = vadd.f32 %v1344_v48, %v1343_v43  ;;  %v1393_v54 = vadd.f32 %v1392_v52, %v1391_v46  ;;  %v1030_v43 = vmul.f32 %v1748_v35, %v1748_v35  ;;  %v368_v35 = vld [vmem:[#allocation2 + $0x28] sm:$0xff] }
 0x11b   : > { %v1346_v53 = vpop.f32.mrf.mxu0  ;;  %907 = vst [vmem:[#allocation2 + $0x90] sm:$0xff] %v1760_v49  ;;  %974 = vst [vmem:[%s1618_s27 + $0xa8] sm:$0xff] %v1760_v49  ;;  %v1394_v56 = vpop.f32.mrf.mxu1 }
 0x11c   : > { %v1768_v55 = vadd.f32 %v1345_v50, %v347_v47  ;;  %v1770_v60 = vadd.f32 %v1393_v54, %v363_v51  ;;  %v1060_v50 = vadd.f32 %v1059_v41, %v1029_v5  ;;  %v1031_v51 = vmul.f32 %v1758_v45, %v1758_v45  ;;  %v352_v54 = vld [vmem:[#allocation2 + $0xb8] sm:$0xff] }
 0x11d   : > { %v1347_v58 = vpop.f32.mrf.mxu0  ;;  %v1395_v0 = vpop.f32.mrf.mxu1  ;;  %v370_v41 = vld [vmem:[#allocation2 + $0xf8] sm:$0xff] }
 0x11e   : > { %892 = vst [vmem:[#allocation2 + $0x30] sm:$0xff] %v1768_v55  ;;  %959 = vst [vmem:[%s1618_s27 + $0x30] sm:$0xff] %v1768_v55  ;;  %v1348_v61 = vadd.f32 %v1347_v58, %v1346_v53  ;;  %v1396_v2 = vadd.f32 %v1395_v0, %v1394_v56  ;;  %v1061_v58 = vadd.f32 %v1060_v50, %v1030_v43 }
 0x11f   : > { %v1349_v1 = vpop.f32.mrf.mxu0  ;;  %908 = vst [vmem:[#allocation2 + $0x70] sm:$0xff] %v1770_v60  ;;  %975 = vst [vmem:[%s1618_s27 + $0xb0] sm:$0xff] %v1770_v60  ;;  %v1397_v4 = vpop.f32.mrf.mxu1 }
 0x120   : > { %v1778_v3 = vadd.f32 %v1348_v61, %v348_v57  ;;  %v1780_v8 = vadd.f32 %v1396_v2, %v364_v62  ;;  %v990_v61 = vadd.f32 %v989_v25, %v1758_v45  ;;  %v1032_v62 = vmul.f32 %v1768_v55, %v1768_v55 }
 0x121   : > { %v1350_v7 = vpop.f32.mrf.mxu0  ;;  %v1398_v12 = vpop.f32.mrf.mxu1 }
 0x122   : > { %893 = vst [vmem:[#allocation2 + $0x48] sm:$0xff] %v1778_v3  ;;  %960 = vst [vmem:[%s1618_s27 + $0x38] sm:$0xff] %v1778_v3  ;;  %v1351_v10 = vadd.f32 %v1350_v7, %v1349_v1  ;;  %v1399_v14 = vadd.f32 %v1398_v12, %v1397_v4  ;;  %v991_v7 = vadd.f32 %v990_v61, %v1768_v55  ;;  %v353_v12 = vld [vmem:[#allocation2 + $0x60] sm:$0xff] }
 0x123   : > { %v1352_v13 = vpop.f32.mrf.mxu0  ;;  %909 = vst [vmem:[#allocation2 + $0xc0] sm:$0xff] %v1780_v8  ;;  %976 = vst [vmem:[%s1618_s27 + $0xb8] sm:$0xff] %v1780_v8  ;;  %v1400_v18 = vpop.f32.mrf.mxu1  ;;  %v1033_v45 = vmul.f32 %v1778_v3, %v1778_v3  ;;  %v369_v55 = vld [vmem:[#allocation2 + $0xa0] sm:$0xff] }
 0x124   : > { %v1790_v17 = vadd.f32 %v1351_v10, %v349_v6  ;;  %v1792_v22 = vadd.f32 %v1399_v14, %v365_v11  ;;  %v1062_v6 = vadd.f32 %v1061_v58, %v1031_v51  ;;  %v371_v58 = vld [vmem:[#allocation2 + $0x20] sm:$0xff] }
 0x125   : > { %v1353_v21 = vpop.f32.mrf.mxu0  ;;  %v1401_v30 = vpop.f32.mrf.mxu1 }
 0x126   : > { %894 = vst [vmem:[#allocation2 + $0x80] sm:$0xff] %v1790_v17  ;;  %961 = vst [vmem:[%s1618_s27 + $0x40] sm:$0xff] %v1790_v17  ;;  %v1354_v27 = vadd.f32 %v1353_v21, %v1352_v13  ;;  %v1402_v32 = vadd.f32 %v1401_v30, %v1400_v18  ;;  %v1063_v16 = vadd.f32 %v1062_v6, %v1032_v62  ;;  %v356_v6 = vld [vmem:[#allocation2 + $0x78] sm:$0xff] }
 0x127   : > { %v1355_v31 = vpop.f32.mrf.mxu0  ;;  %910 = vst [vmem:[#allocation2 + $0xa8] sm:$0xff] %v1792_v22  ;;  %977 = vst [vmem:[%s1618_s27 + $0xc0] sm:$0xff] %v1792_v22  ;;  %v1403_v36 = vpop.f32.mrf.mxu1  ;;  %v992_v18 = vadd.f32 %v991_v7, %v1778_v3 }
 0x128   : > { %v1809_v34 = vadd.f32 %v1354_v27, %v350_v20  ;;  %v1811_v40 = vadd.f32 %v1402_v32, %v366_v28  ;;  %v1034_v20 = vmul.f32 %v1790_v17, %v1790_v17  ;;  %v1064_v27 = vadd.f32 %v1063_v16, %v1033_v45  ;;  %v354_v32 = vld [vmem:[#allocation2 + $0xf0] sm:$0xff]  ;;  %v372_v16 = vld [vmem:[#allocation2 + $0x98] sm:$0xff] }
 0x129   : > { %v1356_v38 = vpop.f32.mrf.mxu0  ;;  %v1404_v46 = vpop.f32.mrf.mxu1  ;;  %v993_v28 = vadd.f32 %v992_v18, %v1790_v17 }
 0x12a   : > { %895 = vst [vmem:[#allocation2 + $0x88] sm:$0xff] %v1809_v34  ;;  %962 = vst [vmem:[%s1618_s27 + $0x48] sm:$0xff] %v1809_v34  ;;  %v1357_v15 = vadd.f32 %v1356_v38, %v1355_v31  ;;  %v1405_v48 = vadd.f32 %v1404_v46, %v1403_v36  ;;  %v1035_v3 = vmul.f32 %v1809_v34, %v1809_v34 }
 0x12b   : > { %v1358_v47 = vpop.f32.mrf.mxu0  ;;  %911 = vst [vmem:[#allocation2 + $0xd0] sm:$0xff] %v1811_v40  ;;  %978 = vst [vmem:[%s1618_s27 + $0xc8] sm:$0xff] %v1811_v40  ;;  %v1406_v53 = vpop.f32.mrf.mxu1  ;;  %v1065_v5 = vadd.f32 %v1064_v27, %v1034_v20  ;;  %v994_v36 = vadd.f32 %v993_v28, %v1809_v34  ;;  %v355_v34 = vld [vmem:[#allocation2 + $0x8] sm:$0xff] }
 0x12c   : > { %v864_v52 = vadd.f32 %v1357_v15, %v351_v37  ;;  %v1825_v57 = vadd.f32 %v1405_v48, %v367_v44 }
 0x12d   : > { %v1359_v56 = vpop.f32.mrf.mxu0  ;;  %v1407_v1 = vpop.f32.mrf.mxu1  ;;  %v1066_v15 = vadd.f32 %v1065_v5, %v1035_v3  ;;  %v1042_v3 = vmul.f32 %v1710_v63, %v1710_v63 }
 0x12e   : > { %896 = vst [vmem:[#allocation2 + $0xe8] sm:$0xff] %v864_v52  ;;  %963 = vst [vmem:[%s1618_s27 + $0x50] sm:$0xff] %v864_v52  ;;  %v1360_v0 = vadd.f32 %v1359_v56, %v1358_v47  ;;  %v1408_v4 = vadd.f32 %v1407_v1, %v1406_v53  ;;  %v1036_v37 = vmul.f32 %v864_v52, %v864_v52 }
 0x12f   : > { %v1361_v2 = vpop.f32.mrf.mxu0  ;;  %912 = vst [vmem:[#allocation2 + $0x10] sm:$0xff] %v1825_v57  ;;  %979 = vst [vmem:[%s1618_s27 + $0xd0] sm:$0xff] %v1825_v57  ;;  %v1409_v11 = vpop.f32.mrf.mxu1  ;;  %v995_v44 = vadd.f32 %v994_v36, %v864_v52  ;;  %v1044_v36 = vmul.f32 %v1730_v19, %v1730_v19 }
 0x130   : > { %v865_v10 = vadd.f32 %v1360_v0, %v352_v54  ;;  %v1837_v14 = vadd.f32 %v1408_v4, %v368_v35  ;;  %v1067_v51 = vadd.f32 %v1066_v15, %v1036_v37 }
 0x131   : > { %v1362_v13 = vpop.f32.mrf.mxu0  ;;  %v1410_v23 = vpop.f32.mrf.mxu1 }
 0x132   : > { %897 = vst [vmem:[#allocation2 + $0xb8] sm:$0xff] %v865_v10  ;;  %964 = vst [vmem:[%s1618_s27 + $0x58] sm:$0xff] %v865_v10  ;;  %v1363_v21 = vadd.f32 %v1362_v13, %v1361_v2  ;;  %v1411_v26 = vadd.f32 %v1410_v23, %v1409_v11  ;;  %v1037_v46 = vmul.f32 %v865_v10, %v865_v10 }
 0x133   : > { %v1364_v24 = vpop.f32.mrf.mxu0  ;;  %913 = vst [vmem:[#allocation2 + $0x28] sm:$0xff] %v1837_v14  ;;  %980 = vst [vmem:[%s1618_s27 + $0xd8] sm:$0xff] %v1837_v14  ;;  %v1412_v31 = vpop.f32.mrf.mxu1  ;;  %v996_v53 = vadd.f32 %v995_v44, %v865_v10 }
 0x134   : > { %v866_v30 = vadd.f32 %v1363_v21, %v353_v12  ;;  %v1849_v59 = vadd.f32 %v1411_v26, %v369_v55  ;;  %v1068_v0 = vadd.f32 %v1067_v51, %v1037_v46 }
 0x135   : > { %v1365_v33 = vpop.f32.mrf.mxu0  ;;  %v1413_v42 = vpop.f32.mrf.mxu1 }
 0x136   : > { %898 = vst [vmem:[#allocation2 + $0x60] sm:$0xff] %v866_v30  ;;  %965 = vst [vmem:[%s1618_s27 + $0x60] sm:$0xff] %v866_v30  ;;  %v1366_v38 = vadd.f32 %v1365_v33, %v1364_v24  ;;  %v1414_v43 = vadd.f32 %v1413_v42, %v1412_v31  ;;  %v1038_v54 = vmul.f32 %v866_v30, %v866_v30 }
 0x137   : > { %v1367_v17 = vpop.f32.mrf.mxu0  ;;  %914 = vst [vmem:[#allocation2 + $0xa0] sm:$0xff] %v1849_v59  ;;  %981 = vst [vmem:[%s1618_s27 + $0xe0] sm:$0xff] %v1849_v59  ;;  %v1415_v48 = vpop.f32.mrf.mxu1  ;;  %v997_v35 = vadd.f32 %v996_v53, %v866_v30 }
 0x138   : > { %v867_v47 = vadd.f32 %v1366_v38, %v354_v32  ;;  %v1856_v25 = vadd.f32 %v1414_v43, %v370_v41  ;;  %v1069_v10 = vadd.f32 %v1068_v0, %v1038_v54  ;;  %v1043_v32 = vmul.f32 %v1720_v9, %v1720_v9 }
 0x139   : > { %v1368_v50 = vpop.f32.mrf.mxu0  ;;  %v1416_v61 = vpop.f32.mrf.mxu1  ;;  %v1045_v41 = vmul.f32 %v1740_v29, %v1740_v29  ;;  %v1051_v54 = vmul.f32 %v1811_v40, %v1811_v40 }
 0x13a   : > { %899 = vst [vmem:[#allocation2 + $0xf0] sm:$0xff] %v867_v47  ;;  %966 = vst [vmem:[%s1618_s27 + $0x68] sm:$0xff] %v867_v47  ;;  %v1369_v56 = vadd.f32 %v1368_v50, %v1367_v17  ;;  %v1417_v52 = vadd.f32 %v1416_v61, %v1415_v48  ;;  %v1039_v1 = vmul.f32 %v867_v47, %v867_v47 }
 0x13b   : > { %v1370_v62 = vpop.f32.mrf.mxu0  ;;  %915 = vst [vmem:[#allocation2 + $0xf8] sm:$0xff] %v1856_v25  ;;  %982 = vst [vmem:[%s1618_s27 + $0xe8] sm:$0xff] %v1856_v25  ;;  %v1418_v4 = vpop.f32.mrf.mxu1  ;;  %v998_v11 = vadd.f32 %v997_v35, %v867_v47  ;;  %v1052_v61 = vmul.f32 %v1825_v57, %v1825_v57  ;;  %v1054_v35 = vmul.f32 %v1849_v59, %v1849_v59 }
 0x13c   : > { %v868_v2 = vadd.f32 %v1369_v56, %v355_v34  ;;  %v1862_v45 = vadd.f32 %v1417_v52, %v371_v58  ;;  %v1070_v21 = vadd.f32 %v1069_v10, %v1039_v1  ;;  %v1053_v52 = vmul.f32 %v1837_v14, %v1837_v14 }
 0x13d   : > { %v1371_v7 = vpop.f32.mrf.mxu0  ;;  %v1419_v18 = vpop.f32.mrf.mxu1 }
 0x13e   : > { %900 = vst [vmem:[#allocation2 + $0x8] sm:$0xff] %v868_v2  ;;  %967 = vst [vmem:[%s1618_s27 + $0x70] sm:$0xff] %v868_v2  ;;  %v1040_v12 = vmul.f32 %v868_v2, %v868_v2  ;;  %v1372_v13 = vadd.f32 %v1371_v7, %v1370_v62  ;;  %v1420_v20 = vadd.f32 %v1419_v18, %v1418_v4 }
 0x13f   : > { %916 = vst [vmem:[#allocation2 + $0x20] sm:$0xff] %v1862_v45  ;;  %983 = vst [vmem:[%s1618_s27 + $0xf0] sm:$0xff] %v1862_v45  ;;  %v999_v55 = vadd.f32 %v998_v11, %v868_v2  ;;  %v1055_v2 = vmul.f32 %v1856_v25, %v1856_v25 }
 0x140   : > { %v869_v23 = vadd.f32 %v1372_v13, %v356_v6  ;;  %v885_v24 = vadd.f32 %v1420_v20, %v372_v16  ;;  %v1071_v26 = vadd.f32 %v1070_v21, %v1040_v12  ;;  %v1056_v6 = vmul.f32 %v1862_v45, %v1862_v45 }
 0x142   : > { %901 = vst [vmem:[#allocation2 + $0x78] sm:$0xff] %v869_v23  ;;  %968 = vst [vmem:[%s1618_s27 + $0x78] sm:$0xff] %v869_v23  ;;  %v1000_v27 = vadd.f32 %v999_v55, %v869_v23  ;;  %v1041_v28 = vmul.f32 %v869_v23, %v869_v23  ;;  %v1057_v10 = vmul.f32 %v885_v24, %v885_v24 }
 0x143   : > { %917 = vst [vmem:[#allocation2 + $0x98] sm:$0xff] %v885_v24  ;;  %984 = vst [vmem:[%s1618_s27 + $0xf8] sm:$0xff] %v885_v24 }
 0x144   : > { %v1001_v30 = vadd.f32 %v1000_v27, %v1710_v63  ;;  %v1072_v31 = vadd.f32 %v1071_v26, %v1041_v28  ;;  %v1046_v63 = vmul.f32 %v1750_v39, %v1750_v39 }
 0x146   : > { %v1002_v33 = vadd.f32 %v1001_v30, %v1720_v9  ;;  %v1073_v5 = vadd.f32 %v1072_v31, %v1042_v3  ;;  %v1047_v9 = vmul.f32 %v1760_v49, %v1760_v49 }
 0x148   : > { %v1003_v37 = vadd.f32 %v1002_v33, %v1730_v19  ;;  %v1074_v38 = vadd.f32 %v1073_v5, %v1043_v32  ;;  %v1048_v19 = vmul.f32 %v1770_v60, %v1770_v60 }
 0x14a   : > { %v1004_v42 = vadd.f32 %v1003_v37, %v1740_v29  ;;  %v1075_v17 = vadd.f32 %v1074_v38, %v1044_v36  ;;  %v1049_v29 = vmul.f32 %v1780_v8, %v1780_v8 }
 0x14c   : > { %v1076_v43 = vadd.f32 %v1075_v17, %v1045_v41  ;;  %v1005_v15 = vadd.f32 %v1004_v42, %v1750_v39  ;;  %v1050_v39 = vmul.f32 %v1792_v22, %v1792_v22 }
 0x14e   : > { %v1006_v44 = vadd.f32 %v1005_v15, %v1760_v49  ;;  %v1077_v46 = vadd.f32 %v1076_v43, %v1046_v63 }
 0x150   : > { %v1007_v47 = vadd.f32 %v1006_v44, %v1770_v60  ;;  %v1078_v48 = vadd.f32 %v1077_v46, %v1047_v9 }
 0x152   : > { %v1008_v34 = vadd.f32 %v1007_v47, %v1780_v8  ;;  %v1079_v50 = vadd.f32 %v1078_v48, %v1048_v19 }
 0x154   : > { %v1009_v51 = vadd.f32 %v1008_v34, %v1792_v22  ;;  %v1080_v53 = vadd.f32 %v1079_v50, %v1049_v29 }
 0x156   : > { %v1010_v49 = vadd.f32 %v1009_v51, %v1811_v40  ;;  %v1081_v56 = vadd.f32 %v1080_v53, %v1050_v39 }
 0x158   : > { %v1082_v60 = vadd.f32 %v1081_v56, %v1051_v54  ;;  %v1011_v58 = vadd.f32 %v1010_v49, %v1825_v57 }
 0x15a   : > { %v1083_v8 = vadd.f32 %v1082_v60, %v1052_v61  ;;  %v1012_v62 = vadd.f32 %v1011_v58, %v1837_v14 }
 0x15c   : > { %v1084_v22 = vadd.f32 %v1083_v8, %v1053_v52  ;;  %v1013_v0 = vadd.f32 %v1012_v62, %v1849_v59 }
 0x15e   : > { %v1085_v40 = vadd.f32 %v1084_v22, %v1054_v35  ;;  %v1014_v1 = vadd.f32 %v1013_v0, %v1856_v25  ;;  %v985_v25 = vld [vmem:[%s1939_s3] sm:$0x1] }
 0x160   : > { %v1086_v4 = vadd.f32 %v1085_v40, %v1055_v2  ;;  %v1015_v57 = vadd.f32 %v1014_v1, %v1862_v45  ;;  %v1025_v45 = vld [vmem:[%s1940_s4] sm:$0x1] }
 0x162   : > { %v1087_v7 = vadd.f32 %v1086_v4, %v1056_v6  ;;  %v1016_v14 = vadd.f32 %v1015_v57, %v885_v24 }
 0x164   : > { %v1017_v11 = vrot.slane %v1016_v14, 4  ;;  %v1088_v12 = vadd.f32 %v1087_v7, %v1057_v10 }
 0x166   : > { %v1018_v13 = vadd.f32 %v1017_v11, %v1016_v14  ;;  %v1089_v16 = vrot.slane %v1088_v12, 4 }
 0x168   : > { %v1019_v59 = vrot.slane %v1018_v13, 2  ;;  %v1090_v18 = vadd.f32 %v1089_v16, %v1088_v12 }
 0x16a   : > { %v1020_v20 = vadd.f32 %v1019_v59, %v1018_v13  ;;  %v1091_v21 = vrot.slane %v1090_v18, 2 }
 0x16c   : > { %v1021_v55 = vrot.slane %v1020_v20, 1  ;;  %v1092_v23 = vadd.f32 %v1091_v21, %v1090_v18 }
 0x16e   : > { %v1022_v26 = vadd.f32 %v1021_v55, %v1020_v20  ;;  %v1093_v27 = vrot.slane %v1092_v23, 1 }
 0x170   : > { %v1023_v24 = vadd.f32 %v1022_v26, %v985_v25  ;;  %v1094_v28 = vadd.f32 %v1093_v27, %v1092_v23 }
 0x172   : > { %1024 = vst [vmem:[%s1939_s3] sm:$0x1] %v1023_v24  ;;  %v1095_v3 = vadd.f32 %v1094_v28, %v1025_v45 }
 0x174   : > { %1096 = vst [vmem:[%s1940_s4] sm:$0x1] %v1095_v3 }
 0x175 PF: > { %s15_s17 = sadd.s32 1, %s1549_s17   ;;  %s1942_s15 = smov %s1545_s16 }
 0x176   : > { %p12_p6 = scmp.ge.s32.totalorder %s15_s17, 4   ;;  %s1943_s16 = smov %s1945_s18 }
 0x178   :  { %14 = sbr.rel (!%p12_p6) target bundleno = 2 (0x2), region = 97 }

</bundles_post_ra>
